<compile_context>
chip_gen: v7x
topology: tpu7x:2x2x1
jax: 0.10.0
libtpu: 0.0.40
codegen_flags: <defaults>
</compile_context>

<pallas_src>
import functools

import jax
import jax.numpy as jnp
from jax.experimental import pallas as pl
from jax.experimental.pallas import tpu as pltpu


# ----------------------------------------------------------------------------
# Kernel
# ----------------------------------------------------------------------------
def _agent_attention_kernel(x_ref, wqkv_ref, bqkv_ref, wproj_ref, bproj_ref,
                            o_ref, *, num_heads, head_dim, dim, batch_tile,
                            seq_len, compute_dtype, approx_recip):
    """One grid step: `batch_tile` batches x `seq_len` tokens, all heads fused.

    x_ref     : (N, D)   activations, f32 (N = batch_tile * seq_len)
    wqkv_ref  : (D, 3D)  fused QKV weight, compute dtype (scale folded into q)
    bqkv_ref  : (1, 3D)  fused QKV bias, compute dtype (scale folded into q)
    wproj_ref : (D, D)   output projection weight, compute dtype
    bproj_ref : (1, D)   output projection bias, f32
    o_ref     : (N, D)   output block, f32
    """
    cdt = compute_dtype
    n_tok = batch_tile * seq_len

    # Single cast of the activations inside the kernel (hides under the MXU;
    # avoids a separate wrapper-side XLA pass over x in HBM).
    x = x_ref[...].astype(cdt)                                      # (N, D)

    # Fused QKV projection: ONE (N, D) @ (D, 3D) matmul.  Result stays in the
    # compute dtype (bf16 on the fast path) — no f32 round-trip on q/k/v.
    qkv = jnp.dot(x, wqkv_ref[...], preferred_element_type=cdt) + bqkv_ref[...]

    head_outs = []
    for h in range(num_heads):
        lo = h * head_dim
        # Static lane slices of the fused result (XLU lane selects, XLU idle),
        # then a leading-axis split (layout-cheap) to (T, S, hd).
        q3 = qkv[:, 0 * dim + lo:0 * dim + lo + head_dim].reshape(
            batch_tile, seq_len, head_dim)
        k3 = qkv[:, 1 * dim + lo:1 * dim + lo + head_dim].reshape(
            batch_tile, seq_len, head_dim)
        v3 = qkv[:, 2 * dim + lo:2 * dim + lo + head_dim].reshape(
            batch_tile, seq_len, head_dim)

        # Scores (f32); the 1/sqrt(hd) scale is already folded into wq/bq.
        s = jnp.einsum("tqe,tke->tqk", q3, k3,
                       preferred_element_type=jnp.float32)          # (T,S,S)
        s = s - jnp.max(s, axis=-1, keepdims=True)
        p = jnp.exp(s)
        denom = jnp.sum(p, axis=-1, keepdims=True)                  # (T,S,1)

        # Unnormalized PV matmul, then normalize the (T,S,hd) result — S/hd
        # fewer VPU multiplies than scaling the (T,S,S) probabilities.
        o_h = jnp.einsum("tqk,tke->tqe", p.astype(cdt), v3,
                         preferred_element_type=jnp.float32)        # (T,S,hd)
        o_h = o_h * pl.reciprocal(denom, approx=approx_recip)
        head_outs.append(o_h.astype(cdt).reshape(n_tok, head_dim))

    # Head concat along lanes + ONE (N, D) @ (D, D) output projection.
    o_cat = jnp.concatenate(head_outs, axis=-1)                     # (N, D)
    out = jnp.dot(o_cat, wproj_ref[...],
                  preferred_element_type=jnp.float32) + bproj_ref[...]
    o_ref[...] = out.astype(o_ref.dtype)


# ----------------------------------------------------------------------------
# Tiling helpers
# ----------------------------------------------------------------------------
def _step_vmem_bytes(batch_tile, seq, dim, c_itemsize):
    """Rough per-grid-step VMEM estimate (pipeline buffers + live values)."""
    n = batch_tile * seq
    b = 2 * 2 * n * dim * 4                        # x + out blocks, f32, 2 bufs
    b += n * 3 * dim * c_itemsize                  # fused qkv result
    b += 2 * batch_tile * seq * seq * 4            # scores + probs (one head, f32)
    b += n * dim * (c_itemsize + 4)                # head concat + f32 projected out
    b += 4 * dim * dim * c_itemsize + 4 * dim * 4  # resident weights + biases
    return b


def _pick_batch_tile(batch, seq, dim, c_itemsize, vmem_budget=24 * 1024 * 1024):
    """Largest batch tile whose per-step footprint fits a conservative VMEM
    budget (safe on v7x's smaller VMEM).  Small problems collapse to a single
    grid step: the grid is a serial loop on v5e/v6e, so extra steps are pure
    per-step overhead."""
    best = 1
    for t in range(1, batch + 1):
        if batch % t:
            continue
        if t != batch and (t * seq) % 8:
            continue                               # keep blocks sublane-aligned
        if _step_vmem_bytes(t, seq, dim, c_itemsize) <= vmem_budget:
            best = t
    return best


# ----------------------------------------------------------------------------
# Wrapper
# ----------------------------------------------------------------------------
def agent_attention_forward(x, params, *, num_heads,
                            compute_dtype=jnp.bfloat16, batch_tile=None):
    """x: (B, S, D) float32.

    params (the (in, out) transposes of the PyTorch nn.Linear weights):
      w_qkv  : (D, 3D)   b_qkv  : (1, 3D)
      w_proj : (D, D)    b_proj : (1, D)
    """
    B, S, D = x.shape
    assert D % num_heads == 0
    hd = D // num_heads
    scale = hd ** (-0.5)
    cdt = jnp.dtype(compute_dtype)

    # --- Weight prep (done once, outside the kernel). ----------------------
    # Fold the softmax scale into the q columns of the fused QKV weight/bias so
    # the kernel never multiplies the (S, S) scores by it.
    scale_row = jnp.concatenate(
        [jnp.full((D,), scale, jnp.float32),
         jnp.ones((2 * D,), jnp.float32)])[None, :]                 # (1, 3D)
    w_qkv = (params["w_qkv"].astype(jnp.float32) * scale_row).astype(cdt)
    b_qkv = (params["b_qkv"].astype(jnp.float32) * scale_row).astype(cdt)
    w_proj = params["w_proj"].astype(cdt)
    b_proj = params["b_proj"].astype(jnp.float32)

    # --- Batch tiling: work-size + VMEM aware. ------------------------------
    if batch_tile is None:
        batch_tile = _pick_batch_tile(B, S, D, cdt.itemsize)
    assert B % batch_tile == 0
    n_steps = B // batch_tile
    n_tok = batch_tile * S
    if n_steps > 1 and n_tok % 8:                  # sublane-alignment fallback
        batch_tile, n_steps, n_tok = B, 1, B * S

    vmem_need = _step_vmem_bytes(batch_tile, S, D, cdt.itemsize)
    vmem_limit = int(min(32 * 1024 * 1024, max(16 * 1024 * 1024, 2 * vmem_need)))

    # x stays f32 here: the single cast happens inside the kernel.
    x2 = x.reshape(B * S, D)

    kernel = functools.partial(
        _agent_attention_kernel,
        num_heads=num_heads, head_dim=hd, dim=D, batch_tile=batch_tile,
        seq_len=S, compute_dtype=cdt,
        approx_recip=bool(cdt != jnp.dtype(jnp.float32)))

    def _call(weight_pipeline_mode):
        def wspec(shape):
            kw = {}
            if weight_pipeline_mode is not None:
                kw["pipeline_mode"] = weight_pipeline_mode
            return pl.BlockSpec(shape, lambda i: (0,) * len(shape), **kw)

        return pl.pallas_call(
            kernel,
            out_shape=jax.ShapeDtypeStruct((B * S, D), x.dtype),
            grid_spec=pltpu.PrefetchScalarGridSpec(
                num_scalar_prefetch=0,
                grid=(n_steps,),
                in_specs=[
                    pl.BlockSpec((n_tok, D), lambda i: (i, 0)),     # x
                    wspec((D, 3 * D)),                              # w_qkv
                    wspec((1, 3 * D)),                              # b_qkv
                    wspec((D, D)),                                  # w_proj
                    wspec((1, D)),                                  # b_proj
                ],
                out_specs=pl.BlockSpec((n_tok, D), lambda i: (i, 0)),
            ),
            compiler_params=pltpu.CompilerParams(
                dimension_semantics=("parallel",),
                vmem_limit_bytes=vmem_limit),
        )(x2, w_qkv, b_qkv, w_proj, b_proj)

    try:
        # Weights/biases are grid-invariant: single-buffer them to halve their
        # VMEM footprint (they never need double buffering).
        out2 = _call(pl.Buffered(1))
    except Exception:
        out2 = _call(None)      # conservative fallback: default buffering

    return out2.reshape(B, S, D)


# ----------------------------------------------------------------------------
# Pure-JAX reference (mirrors the PyTorch forward exactly)
# ----------------------------------------------------------------------------
def _reference(x, params, *, num_heads):
    B, S, D = x.shape
    hd = D // num_heads
    scale = hd ** (-0.5)
    qkv = x @ params["w_qkv"] + params["b_qkv"][0]            # (B, S, 3D)
    qkv = qkv.reshape(B, S, 3, num_heads, hd)
    q, k, v = jnp.moveaxis(qkv, 2, 0)                         # (B, S, H, hd)
    q = q.transpose(0, 2, 1, 3)                               # (B, H, S, hd)
    k = k.transpose(0, 2, 1, 3)
    v = v.transpose(0, 2, 1, 3)
    attn = (q @ k.transpose(0, 1, 3, 2)) * scale              # (B, H, S, S)
    attn = jax.nn.softmax(attn, axis=-1)
    out = attn @ v                                            # (B, H, S, hd)
    out = out.transpose(0, 2, 1, 3).reshape(B, S, D)
    return out @ params["w_proj"] + params["b_proj"][0]


if __name__ == "__main__":
    # Small shapes consistent with the module: batch=2, seq=8, dim=32, heads=4.
    B, S, D, H = 2, 8, 32, 4

    key = jax.random.PRNGKey(0)
    kx, k1, k2, k3, k4 = jax.random.split(key, 5)

    x = jax.random.normal(kx, (B, S, D), dtype=jnp.float32)
    params = {
        "w_qkv": jax.random.normal(k1, (D, 3 * D), jnp.float32) * (1.0 / D ** 0.5),
        "b_qkv": jax.random.normal(k2, (1, 3 * D), jnp.float32) * 0.02,
        "w_proj": jax.random.normal(k3, (D, D), jnp.float32) * (1.0 / D ** 0.5),
        "b_proj": jax.random.normal(k4, (1, D), jnp.float32) * 0.02,
    }

    ref = _reference(x, params, num_heads=H)

    # f32 compute path: parity check of the kernel logic (exact reciprocal).
    out_f32 = jax.block_until_ready(
        agent_attention_forward(x, params, num_heads=H,
                                compute_dtype=jnp.float32))
    assert out_f32.shape == (B, S, D)
    assert jnp.allclose(out_f32, ref, rtol=1e-2, atol=1e-2), "f32 mismatch"

    # bf16 compute path (MXU-friendly on v6e/v7x): sanity-bounded check.
    out_bf16 = jax.block_until_ready(
        agent_attention_forward(x, params, num_heads=H,
                                compute_dtype=jnp.bfloat16))
    assert out_bf16.shape == (B, S, D)
    assert jnp.max(jnp.abs(out_bf16 - ref)) < 0.25, "bf16 mismatch"

    print("KERNEL_OK")
</pallas_src>

<mosaic_0001>
module attributes {stable_mosaic.version = 11 : i64} {
  func.func @_agent_attention_kernel(%arg0: i32, %arg1: memref<16x32xf32, #tpu.memory_space<vmem>>, %arg2: memref<32x96xf32, #tpu.memory_space<vmem>>, %arg3: memref<1x96xf32, #tpu.memory_space<vmem>>, %arg4: memref<32x32xf32, #tpu.memory_space<vmem>>, %arg5: memref<1x32xf32, #tpu.memory_space<vmem>>, %arg6: memref<16x32xf32, #tpu.memory_space<vmem>>) attributes {dimension_semantics = [#tpu.dimension_semantics<parallel>], iteration_bounds = array<i64: 1>, scalar_prefetch = 0 : i64, scratch_operands = 0 : i64, tpu.core_type = #tpu.core_type<tc>, window_params = [{transform_indices = @transform_0, window_bounds = array<i64: 16, 32>}, {pipeline_mode = #tpu.pipeline_mode<synchronous>, transform_indices = @transform_1, window_bounds = array<i64: 32, 96>}, {pipeline_mode = #tpu.pipeline_mode<synchronous>, transform_indices = @transform_2, window_bounds = array<i64: 1, 96>}, {pipeline_mode = #tpu.pipeline_mode<synchronous>, transform_indices = @transform_3, window_bounds = array<i64: 32, 32>}, {pipeline_mode = #tpu.pipeline_mode<synchronous>, transform_indices = @transform_4, window_bounds = array<i64: 1, 32>}, {transform_indices = @transform_5, window_bounds = array<i64: 16, 32>}]} {
    %c0 = arith.constant 0 : index
    %c0_0 = arith.constant 0 : index
    %0 = vector.load %arg1[%c0, %c0_0] : memref<16x32xf32, #tpu.memory_space<vmem>>, vector<16x32xf32>
    %c0_1 = arith.constant 0 : index
    %c0_2 = arith.constant 0 : index
    %1 = vector.load %arg2[%c0_1, %c0_2] : memref<32x96xf32, #tpu.memory_space<vmem>>, vector<32x96xf32>
    %cst = arith.constant dense<0.000000e+00> : vector<16x96xf32>
    %2 = tpu.matmul %0, %1, %cst {dimension_numbers = #tpu.dot_dimension_numbers<[1], [0], [0], [1], [0, 0, 1, 1], [], []>} : vector<16x32xf32>, vector<32x96xf32>, vector<16x96xf32> -> vector<16x96xf32>
    %c0_3 = arith.constant 0 : index
    %c0_4 = arith.constant 0 : index
    %3 = vector.load %arg3[%c0_3, %c0_4] : memref<1x96xf32, #tpu.memory_space<vmem>>, vector<1x96xf32>
    %4 = vector.broadcast %3 : vector<1x96xf32> to vector<16x96xf32>
    %5 = arith.addf %2, %4 : vector<16x96xf32>
    %6 = vector.extract_strided_slice %5 {offsets = [0, 0], sizes = [16, 8], strides = [1, 1]} : vector<16x96xf32> to vector<16x8xf32>
    %7 = vector.shape_cast %6 : vector<16x8xf32> to vector<2x8x8xf32>
    %8 = vector.extract_strided_slice %5 {offsets = [0, 32], sizes = [16, 8], strides = [1, 1]} : vector<16x96xf32> to vector<16x8xf32>
    %9 = vector.shape_cast %8 : vector<16x8xf32> to vector<2x8x8xf32>
    %10 = vector.extract_strided_slice %5 {offsets = [0, 64], sizes = [16, 8], strides = [1, 1]} : vector<16x96xf32> to vector<16x8xf32>
    %11 = vector.shape_cast %10 : vector<16x8xf32> to vector<2x8x8xf32>
    "tpu.trace_start"() <{level = 10 : i32, message = "tqe,tke->tqk"}> : () -> ()
    %cst_5 = arith.constant dense<0.000000e+00> : vector<2x8x8xf32>
    %12 = tpu.matmul %7, %9, %cst_5 {dimension_numbers = #tpu.dot_dimension_numbers<[2], [2], [1], [1], [0, 0, 0, 1, 1, 1], [0], [0]>} : vector<2x8x8xf32>, vector<2x8x8xf32>, vector<2x8x8xf32> -> vector<2x8x8xf32>
    "tpu.trace_stop"() : () -> ()
    %cst_6 = arith.constant dense<0xFF800000> : vector<2x8xf32>
    %13 = vector.multi_reduction <maximumf>, %12, %cst_6 [2] : vector<2x8x8xf32> to vector<2x8xf32>
    %14 = vector.shape_cast %13 : vector<2x8xf32> to vector<2x8x1xf32>
    %15 = vector.broadcast %14 : vector<2x8x1xf32> to vector<2x8x8xf32>
    %16 = arith.subf %12, %15 : vector<2x8x8xf32>
    %17 = math.exp %16 : vector<2x8x8xf32>
    %cst_7 = arith.constant dense<0.000000e+00> : vector<2x8xf32>
    %18 = vector.multi_reduction <add>, %17, %cst_7 [2] : vector<2x8x8xf32> to vector<2x8xf32>
    %19 = vector.shape_cast %18 : vector<2x8xf32> to vector<2x8x1xf32>
    "tpu.trace_start"() <{level = 10 : i32, message = "tqk,tke->tqe"}> : () -> ()
    %cst_8 = arith.constant dense<0.000000e+00> : vector<2x8x8xf32>
    %20 = tpu.matmul %17, %11, %cst_8 {dimension_numbers = #tpu.dot_dimension_numbers<[2], [1], [1], [2], [0, 0, 0, 1, 1, 2], [0], [0]>} : vector<2x8x8xf32>, vector<2x8x8xf32>, vector<2x8x8xf32> -> vector<2x8x8xf32>
    "tpu.trace_stop"() : () -> ()
    %21 = tpu.reciprocal %19 : vector<2x8x1xf32> -> vector<2x8x1xf32>
    %22 = vector.broadcast %21 : vector<2x8x1xf32> to vector<2x8x8xf32>
    %23 = arith.mulf %20, %22 : vector<2x8x8xf32>
    %24 = vector.shape_cast %23 : vector<2x8x8xf32> to vector<16x8xf32>
    %25 = vector.extract_strided_slice %5 {offsets = [0, 8], sizes = [16, 8], strides = [1, 1]} : vector<16x96xf32> to vector<16x8xf32>
    %26 = vector.shape_cast %25 : vector<16x8xf32> to vector<2x8x8xf32>
    %27 = vector.extract_strided_slice %5 {offsets = [0, 40], sizes = [16, 8], strides = [1, 1]} : vector<16x96xf32> to vector<16x8xf32>
    %28 = vector.shape_cast %27 : vector<16x8xf32> to vector<2x8x8xf32>
    %29 = vector.extract_strided_slice %5 {offsets = [0, 72], sizes = [16, 8], strides = [1, 1]} : vector<16x96xf32> to vector<16x8xf32>
    %30 = vector.shape_cast %29 : vector<16x8xf32> to vector<2x8x8xf32>
    "tpu.trace_start"() <{level = 10 : i32, message = "tqe,tke->tqk"}> : () -> ()
    %cst_9 = arith.constant dense<0.000000e+00> : vector<2x8x8xf32>
    %31 = tpu.matmul %26, %28, %cst_9 {dimension_numbers = #tpu.dot_dimension_numbers<[2], [2], [1], [1], [0, 0, 0, 1, 1, 1], [0], [0]>} : vector<2x8x8xf32>, vector<2x8x8xf32>, vector<2x8x8xf32> -> vector<2x8x8xf32>
    "tpu.trace_stop"() : () -> ()
    %cst_10 = arith.constant dense<0xFF800000> : vector<2x8xf32>
    %32 = vector.multi_reduction <maximumf>, %31, %cst_10 [2] : vector<2x8x8xf32> to vector<2x8xf32>
    %33 = vector.shape_cast %32 : vector<2x8xf32> to vector<2x8x1xf32>
    %34 = vector.broadcast %33 : vector<2x8x1xf32> to vector<2x8x8xf32>
    %35 = arith.subf %31, %34 : vector<2x8x8xf32>
    %36 = math.exp %35 : vector<2x8x8xf32>
    %cst_11 = arith.constant dense<0.000000e+00> : vector<2x8xf32>
    %37 = vector.multi_reduction <add>, %36, %cst_11 [2] : vector<2x8x8xf32> to vector<2x8xf32>
    %38 = vector.shape_cast %37 : vector<2x8xf32> to vector<2x8x1xf32>
    "tpu.trace_start"() <{level = 10 : i32, message = "tqk,tke->tqe"}> : () -> ()
    %cst_12 = arith.constant dense<0.000000e+00> : vector<2x8x8xf32>
    %39 = tpu.matmul %36, %30, %cst_12 {dimension_numbers = #tpu.dot_dimension_numbers<[2], [1], [1], [2], [0, 0, 0, 1, 1, 2], [0], [0]>} : vector<2x8x8xf32>, vector<2x8x8xf32>, vector<2x8x8xf32> -> vector<2x8x8xf32>
    "tpu.trace_stop"() : () -> ()
    %40 = tpu.reciprocal %38 : vector<2x8x1xf32> -> vector<2x8x1xf32>
    %41 = vector.broadcast %40 : vector<2x8x1xf32> to vector<2x8x8xf32>
    %42 = arith.mulf %39, %41 : vector<2x8x8xf32>
    %43 = vector.shape_cast %42 : vector<2x8x8xf32> to vector<16x8xf32>
    %44 = vector.extract_strided_slice %5 {offsets = [0, 16], sizes = [16, 8], strides = [1, 1]} : vector<16x96xf32> to vector<16x8xf32>
    %45 = vector.shape_cast %44 : vector<16x8xf32> to vector<2x8x8xf32>
    %46 = vector.extract_strided_slice %5 {offsets = [0, 48], sizes = [16, 8], strides = [1, 1]} : vector<16x96xf32> to vector<16x8xf32>
    %47 = vector.shape_cast %46 : vector<16x8xf32> to vector<2x8x8xf32>
    %48 = vector.extract_strided_slice %5 {offsets = [0, 80], sizes = [16, 8], strides = [1, 1]} : vector<16x96xf32> to vector<16x8xf32>
    %49 = vector.shape_cast %48 : vector<16x8xf32> to vector<2x8x8xf32>
    "tpu.trace_start"() <{level = 10 : i32, message = "tqe,tke->tqk"}> : () -> ()
    %cst_13 = arith.constant dense<0.000000e+00> : vector<2x8x8xf32>
    %50 = tpu.matmul %45, %47, %cst_13 {dimension_numbers = #tpu.dot_dimension_numbers<[2], [2], [1], [1], [0, 0, 0, 1, 1, 1], [0], [0]>} : vector<2x8x8xf32>, vector<2x8x8xf32>, vector<2x8x8xf32> -> vector<2x8x8xf32>
    "tpu.trace_stop"() : () -> ()
    %cst_14 = arith.constant dense<0xFF800000> : vector<2x8xf32>
    %51 = vector.multi_reduction <maximumf>, %50, %cst_14 [2] : vector<2x8x8xf32> to vector<2x8xf32>
    %52 = vector.shape_cast %51 : vector<2x8xf32> to vector<2x8x1xf32>
    %53 = vector.broadcast %52 : vector<2x8x1xf32> to vector<2x8x8xf32>
    %54 = arith.subf %50, %53 : vector<2x8x8xf32>
    %55 = math.exp %54 : vector<2x8x8xf32>
    %cst_15 = arith.constant dense<0.000000e+00> : vector<2x8xf32>
    %56 = vector.multi_reduction <add>, %55, %cst_15 [2] : vector<2x8x8xf32> to vector<2x8xf32>
    %57 = vector.shape_cast %56 : vector<2x8xf32> to vector<2x8x1xf32>
    "tpu.trace_start"() <{level = 10 : i32, message = "tqk,tke->tqe"}> : () -> ()
    %cst_16 = arith.constant dense<0.000000e+00> : vector<2x8x8xf32>
    %58 = tpu.matmul %55, %49, %cst_16 {dimension_numbers = #tpu.dot_dimension_numbers<[2], [1], [1], [2], [0, 0, 0, 1, 1, 2], [0], [0]>} : vector<2x8x8xf32>, vector<2x8x8xf32>, vector<2x8x8xf32> -> vector<2x8x8xf32>
    "tpu.trace_stop"() : () -> ()
    %59 = tpu.reciprocal %57 : vector<2x8x1xf32> -> vector<2x8x1xf32>
    %60 = vector.broadcast %59 : vector<2x8x1xf32> to vector<2x8x8xf32>
    %61 = arith.mulf %58, %60 : vector<2x8x8xf32>
    %62 = vector.shape_cast %61 : vector<2x8x8xf32> to vector<16x8xf32>
    %63 = vector.extract_strided_slice %5 {offsets = [0, 24], sizes = [16, 8], strides = [1, 1]} : vector<16x96xf32> to vector<16x8xf32>
    %64 = vector.shape_cast %63 : vector<16x8xf32> to vector<2x8x8xf32>
    %65 = vector.extract_strided_slice %5 {offsets = [0, 56], sizes = [16, 8], strides = [1, 1]} : vector<16x96xf32> to vector<16x8xf32>
    %66 = vector.shape_cast %65 : vector<16x8xf32> to vector<2x8x8xf32>
    %67 = vector.extract_strided_slice %5 {offsets = [0, 88], sizes = [16, 8], strides = [1, 1]} : vector<16x96xf32> to vector<16x8xf32>
    %68 = vector.shape_cast %67 : vector<16x8xf32> to vector<2x8x8xf32>
    "tpu.trace_start"() <{level = 10 : i32, message = "tqe,tke->tqk"}> : () -> ()
    %cst_17 = arith.constant dense<0.000000e+00> : vector<2x8x8xf32>
    %69 = tpu.matmul %64, %66, %cst_17 {dimension_numbers = #tpu.dot_dimension_numbers<[2], [2], [1], [1], [0, 0, 0, 1, 1, 1], [0], [0]>} : vector<2x8x8xf32>, vector<2x8x8xf32>, vector<2x8x8xf32> -> vector<2x8x8xf32>
    "tpu.trace_stop"() : () -> ()
    %cst_18 = arith.constant dense<0xFF800000> : vector<2x8xf32>
    %70 = vector.multi_reduction <maximumf>, %69, %cst_18 [2] : vector<2x8x8xf32> to vector<2x8xf32>
    %71 = vector.shape_cast %70 : vector<2x8xf32> to vector<2x8x1xf32>
    %72 = vector.broadcast %71 : vector<2x8x1xf32> to vector<2x8x8xf32>
    %73 = arith.subf %69, %72 : vector<2x8x8xf32>
    %74 = math.exp %73 : vector<2x8x8xf32>
    %cst_19 = arith.constant dense<0.000000e+00> : vector<2x8xf32>
    %75 = vector.multi_reduction <add>, %74, %cst_19 [2] : vector<2x8x8xf32> to vector<2x8xf32>
    %76 = vector.shape_cast %75 : vector<2x8xf32> to vector<2x8x1xf32>
    "tpu.trace_start"() <{level = 10 : i32, message = "tqk,tke->tqe"}> : () -> ()
    %cst_20 = arith.constant dense<0.000000e+00> : vector<2x8x8xf32>
    %77 = tpu.matmul %74, %68, %cst_20 {dimension_numbers = #tpu.dot_dimension_numbers<[2], [1], [1], [2], [0, 0, 0, 1, 1, 2], [0], [0]>} : vector<2x8x8xf32>, vector<2x8x8xf32>, vector<2x8x8xf32> -> vector<2x8x8xf32>
    "tpu.trace_stop"() : () -> ()
    %78 = tpu.reciprocal %76 : vector<2x8x1xf32> -> vector<2x8x1xf32>
    %79 = vector.broadcast %78 : vector<2x8x1xf32> to vector<2x8x8xf32>
    %80 = arith.mulf %77, %79 : vector<2x8x8xf32>
    %81 = vector.shape_cast %80 : vector<2x8x8xf32> to vector<16x8xf32>
    %82 = tpu.concatenate %24, %43, %62, %81 in 1 : vector<16x8xf32>, vector<16x8xf32>, vector<16x8xf32>, vector<16x8xf32> -> vector<16x32xf32>
    %c0_21 = arith.constant 0 : index
    %c0_22 = arith.constant 0 : index
    %83 = vector.load %arg4[%c0_21, %c0_22] : memref<32x32xf32, #tpu.memory_space<vmem>>, vector<32x32xf32>
    %cst_23 = arith.constant dense<0.000000e+00> : vector<16x32xf32>
    %84 = tpu.matmul %82, %83, %cst_23 {dimension_numbers = #tpu.dot_dimension_numbers<[1], [0], [0], [1], [0, 0, 1, 1], [], []>} : vector<16x32xf32>, vector<32x32xf32>, vector<16x32xf32> -> vector<16x32xf32>
    %c0_24 = arith.constant 0 : index
    %c0_25 = arith.constant 0 : index
    %85 = vector.load %arg5[%c0_24, %c0_25] : memref<1x32xf32, #tpu.memory_space<vmem>>, vector<1x32xf32>
    %86 = vector.broadcast %85 : vector<1x32xf32> to vector<16x32xf32>
    %87 = arith.addf %84, %86 : vector<16x32xf32>
    %c0_26 = arith.constant 0 : index
    %c0_27 = arith.constant 0 : index
    %88 = vector.load %arg6[%c0_26, %c0_27] : memref<16x32xf32, #tpu.memory_space<vmem>>, vector<16x32xf32>
    tpu.vector_store %arg6[%c0_26, %c0_27], %87 {strides = array<i32>} : memref<16x32xf32, #tpu.memory_space<vmem>>, vector<16x32xf32>,
    return
  }
  func.func @transform_0(%arg0: i32) -> (i32, i32) {
    %c0_i32 = arith.constant 0 : i32
    %c0_i32_0 = arith.constant 0 : i32
    return %arg0, %c0_i32 : i32, i32
  }
  func.func @transform_1(%arg0: i32) -> (i32, i32) {
    %c0_i32 = arith.constant 0 : i32
    %c0_i32_0 = arith.constant 0 : i32
    %c0_i32_1 = arith.constant 0 : i32
    return %c0_i32, %c0_i32_0 : i32, i32
  }
  func.func @transform_2(%arg0: i32) -> (i32, i32) {
    %c0_i32 = arith.constant 0 : i32
    %c0_i32_0 = arith.constant 0 : i32
    %c0_i32_1 = arith.constant 0 : i32
    return %c0_i32, %c0_i32_0 : i32, i32
  }
  func.func @transform_3(%arg0: i32) -> (i32, i32) {
    %c0_i32 = arith.constant 0 : i32
    %c0_i32_0 = arith.constant 0 : i32
    %c0_i32_1 = arith.constant 0 : i32
    return %c0_i32, %c0_i32_0 : i32, i32
  }
  func.func @transform_4(%arg0: i32) -> (i32, i32) {
    %c0_i32 = arith.constant 0 : i32
    %c0_i32_0 = arith.constant 0 : i32
    %c0_i32_1 = arith.constant 0 : i32
    return %c0_i32, %c0_i32_0 : i32, i32
  }
  func.func @transform_5(%arg0: i32) -> (i32, i32) {
    %c0_i32 = arith.constant 0 : i32
    %c0_i32_0 = arith.constant 0 : i32
    return %arg0, %c0_i32 : i32, i32
  }
}

module attributes {stable_mosaic.version = 11 : i64} {
  func.func @_agent_attention_kernel(%arg0: i32, %arg1: memref<16x32xf32, #tpu.memory_space<vmem>>, %arg2: memref<32x96xf32, #tpu.memory_space<vmem>>, %arg3: memref<1x96xf32, #tpu.memory_space<vmem>>, %arg4: memref<32x32xf32, #tpu.memory_space<vmem>>, %arg5: memref<1x32xf32, #tpu.memory_space<vmem>>, %arg6: memref<16x32xf32, #tpu.memory_space<vmem>>) attributes {dimension_semantics = [#tpu.dimension_semantics<parallel>], iteration_bounds = array<i64: 1>, scalar_prefetch = 0 : i64, scratch_operands = 0 : i64, tpu.core_type = #tpu.core_type<tc>, window_params = [{transform_indices = @transform_0, window_bounds = array<i64: 16, 32>}, {pipeline_mode = #tpu.pipeline_mode<synchronous>, transform_indices = @transform_1, window_bounds = array<i64: 32, 96>}, {pipeline_mode = #tpu.pipeline_mode<synchronous>, transform_indices = @transform_2, window_bounds = array<i64: 1, 96>}, {pipeline_mode = #tpu.pipeline_mode<synchronous>, transform_indices = @transform_3, window_bounds = array<i64: 32, 32>}, {pipeline_mode = #tpu.pipeline_mode<synchronous>, transform_indices = @transform_4, window_bounds = array<i64: 1, 32>}, {transform_indices = @transform_5, window_bounds = array<i64: 16, 32>}]} {
    %c0 = arith.constant 0 : index
    %c0_0 = arith.constant 0 : index
    %0 = vector.load %arg1[%c0, %c0_0] : memref<16x32xf32, #tpu.memory_space<vmem>>, vector<16x32xf32>
    %c0_1 = arith.constant 0 : index
    %c0_2 = arith.constant 0 : index
    %1 = vector.load %arg2[%c0_1, %c0_2] : memref<32x96xf32, #tpu.memory_space<vmem>>, vector<32x96xf32>
    %cst = arith.constant dense<0.000000e+00> : vector<16x96xf32>
    %2 = tpu.matmul %0, %1, %cst {dimension_numbers = #tpu.dot_dimension_numbers<[1], [0], [0], [1], [0, 0, 1, 1], [], []>} : vector<16x32xf32>, vector<32x96xf32>, vector<16x96xf32> -> vector<16x96xf32>
    %c0_3 = arith.constant 0 : index
    %c0_4 = arith.constant 0 : index
    %3 = vector.load %arg3[%c0_3, %c0_4] : memref<1x96xf32, #tpu.memory_space<vmem>>, vector<1x96xf32>
    %4 = vector.broadcast %3 : vector<1x96xf32> to vector<16x96xf32>
    %5 = arith.addf %2, %4 : vector<16x96xf32>
    %6 = vector.extract_strided_slice %5 {offsets = [0, 0], sizes = [16, 8], strides = [1, 1]} : vector<16x96xf32> to vector<16x8xf32>
    %7 = vector.shape_cast %6 : vector<16x8xf32> to vector<2x8x8xf32>
    %8 = vector.extract_strided_slice %5 {offsets = [0, 32], sizes = [16, 8], strides = [1, 1]} : vector<16x96xf32> to vector<16x8xf32>
    %9 = vector.shape_cast %8 : vector<16x8xf32> to vector<2x8x8xf32>
    %10 = vector.extract_strided_slice %5 {offsets = [0, 64], sizes = [16, 8], strides = [1, 1]} : vector<16x96xf32> to vector<16x8xf32>
    %11 = vector.shape_cast %10 : vector<16x8xf32> to vector<2x8x8xf32>
    "tpu.trace_start"() <{level = 10 : i32, message = "tqe,tke->tqk"}> : () -> ()
    %cst_5 = arith.constant dense<0.000000e+00> : vector<2x8x8xf32>
    %12 = tpu.matmul %7, %9, %cst_5 {dimension_numbers = #tpu.dot_dimension_numbers<[2], [2], [1], [1], [0, 0, 0, 1, 1, 1], [0], [0]>} : vector<2x8x8xf32>, vector<2x8x8xf32>, vector<2x8x8xf32> -> vector<2x8x8xf32>
    "tpu.trace_stop"() : () -> ()
    %cst_6 = arith.constant dense<0xFF800000> : vector<2x8xf32>
    %13 = vector.multi_reduction <maximumf>, %12, %cst_6 [2] : vector<2x8x8xf32> to vector<2x8xf32>
    %14 = vector.shape_cast %13 : vector<2x8xf32> to vector<2x8x1xf32>
    %15 = vector.broadcast %14 : vector<2x8x1xf32> to vector<2x8x8xf32>
    %16 = arith.subf %12, %15 : vector<2x8x8xf32>
    %17 = math.exp %16 : vector<2x8x8xf32>
    %cst_7 = arith.constant dense<0.000000e+00> : vector<2x8xf32>
    %18 = vector.multi_reduction <add>, %17, %cst_7 [2] : vector<2x8x8xf32> to vector<2x8xf32>
    %19 = vector.shape_cast %18 : vector<2x8xf32> to vector<2x8x1xf32>
    "tpu.trace_start"() <{level = 10 : i32, message = "tqk,tke->tqe"}> : () -> ()
    %cst_8 = arith.constant dense<0.000000e+00> : vector<2x8x8xf32>
    %20 = tpu.matmul %17, %11, %cst_8 {dimension_numbers = #tpu.dot_dimension_numbers<[2], [1], [1], [2], [0, 0, 0, 1, 1, 2], [0], [0]>} : vector<2x8x8xf32>, vector<2x8x8xf32>, vector<2x8x8xf32> -> vector<2x8x8xf32>
    "tpu.trace_stop"() : () -> ()
    %21 = tpu.reciprocal %19 : vector<2x8x1xf32> -> vector<2x8x1xf32>
    %22 = vector.broadcast %21 : vector<2x8x1xf32> to vector<2x8x8xf32>
    %23 = arith.mulf %20, %22 : vector<2x8x8xf32>
    %24 = vector.shape_cast %23 : vector<2x8x8xf32> to vector<16x8xf32>
    %25 = vector.extract_strided_slice %5 {offsets = [0, 8], sizes = [16, 8], strides = [1, 1]} : vector<16x96xf32> to vector<16x8xf32>
    %26 = vector.shape_cast %25 : vector<16x8xf32> to vector<2x8x8xf32>
    %27 = vector.extract_strided_slice %5 {offsets = [0, 40], sizes = [16, 8], strides = [1, 1]} : vector<16x96xf32> to vector<16x8xf32>
    %28 = vector.shape_cast %27 : vector<16x8xf32> to vector<2x8x8xf32>
    %29 = vector.extract_strided_slice %5 {offsets = [0, 72], sizes = [16, 8], strides = [1, 1]} : vector<16x96xf32> to vector<16x8xf32>
    %30 = vector.shape_cast %29 : vector<16x8xf32> to vector<2x8x8xf32>
    "tpu.trace_start"() <{level = 10 : i32, message = "tqe,tke->tqk"}> : () -> ()
    %cst_9 = arith.constant dense<0.000000e+00> : vector<2x8x8xf32>
    %31 = tpu.matmul %26, %28, %cst_9 {dimension_numbers = #tpu.dot_dimension_numbers<[2], [2], [1], [1], [0, 0, 0, 1, 1, 1], [0], [0]>} : vector<2x8x8xf32>, vector<2x8x8xf32>, vector<2x8x8xf32> -> vector<2x8x8xf32>
    "tpu.trace_stop"() : () -> ()
    %cst_10 = arith.constant dense<0xFF800000> : vector<2x8xf32>
    %32 = vector.multi_reduction <maximumf>, %31, %cst_10 [2] : vector<2x8x8xf32> to vector<2x8xf32>
    %33 = vector.shape_cast %32 : vector<2x8xf32> to vector<2x8x1xf32>
    %34 = vector.broadcast %33 : vector<2x8x1xf32> to vector<2x8x8xf32>
    %35 = arith.subf %31, %34 : vector<2x8x8xf32>
    %36 = math.exp %35 : vector<2x8x8xf32>
    %cst_11 = arith.constant dense<0.000000e+00> : vector<2x8xf32>
    %37 = vector.multi_reduction <add>, %36, %cst_11 [2] : vector<2x8x8xf32> to vector<2x8xf32>
    %38 = vector.shape_cast %37 : vector<2x8xf32> to vector<2x8x1xf32>
    "tpu.trace_start"() <{level = 10 : i32, message = "tqk,tke->tqe"}> : () -> ()
    %cst_12 = arith.constant dense<0.000000e+00> : vector<2x8x8xf32>
    %39 = tpu.matmul %36, %30, %cst_12 {dimension_numbers = #tpu.dot_dimension_numbers<[2], [1], [1], [2], [0, 0, 0, 1, 1, 2], [0], [0]>} : vector<2x8x8xf32>, vector<2x8x8xf32>, vector<2x8x8xf32> -> vector<2x8x8xf32>
    "tpu.trace_stop"() : () -> ()
    %40 = tpu.reciprocal %38 : vector<2x8x1xf32> -> vector<2x8x1xf32>
    %41 = vector.broadcast %40 : vector<2x8x1xf32> to vector<2x8x8xf32>
    %42 = arith.mulf %39, %41 : vector<2x8x8xf32>
    %43 = vector.shape_cast %42 : vector<2x8x8xf32> to vector<16x8xf32>
    %44 = vector.extract_strided_slice %5 {offsets = [0, 16], sizes = [16, 8], strides = [1, 1]} : vector<16x96xf32> to vector<16x8xf32>
    %45 = vector.shape_cast %44 : vector<16x8xf32> to vector<2x8x8xf32>
    %46 = vector.extract_strided_slice %5 {offsets = [0, 48], sizes = [16, 8], strides = [1, 1]} : vector<16x96xf32> to vector<16x8xf32>
    %47 = vector.shape_cast %46 : vector<16x8xf32> to vector<2x8x8xf32>
    %48 = vector.extract_strided_slice %5 {offsets = [0, 80], sizes = [16, 8], strides = [1, 1]} : vector<16x96xf32> to vector<16x8xf32>
    %49 = vector.shape_cast %48 : vector<16x8xf32> to vector<2x8x8xf32>
    "tpu.trace_start"() <{level = 10 : i32, message = "tqe,tke->tqk"}> : () -> ()
    %cst_13 = arith.constant dense<0.000000e+00> : vector<2x8x8xf32>
    %50 = tpu.matmul %45, %47, %cst_13 {dimension_numbers = #tpu.dot_dimension_numbers<[2], [2], [1], [1], [0, 0, 0, 1, 1, 1], [0], [0]>} : vector<2x8x8xf32>, vector<2x8x8xf32>, vector<2x8x8xf32> -> vector<2x8x8xf32>
    "tpu.trace_stop"() : () -> ()
    %cst_14 = arith.constant dense<0xFF800000> : vector<2x8xf32>
    %51 = vector.multi_reduction <maximumf>, %50, %cst_14 [2] : vector<2x8x8xf32> to vector<2x8xf32>
    %52 = vector.shape_cast %51 : vector<2x8xf32> to vector<2x8x1xf32>
    %53 = vector.broadcast %52 : vector<2x8x1xf32> to vector<2x8x8xf32>
    %54 = arith.subf %50, %53 : vector<2x8x8xf32>
    %55 = math.exp %54 : vector<2x8x8xf32>
    %cst_15 = arith.constant dense<0.000000e+00> : vector<2x8xf32>
    %56 = vector.multi_reduction <add>, %55, %cst_15 [2] : vector<2x8x8xf32> to vector<2x8xf32>
    %57 = vector.shape_cast %56 : vector<2x8xf32> to vector<2x8x1xf32>
    "tpu.trace_start"() <{level = 10 : i32, message = "tqk,tke->tqe"}> : () -> ()
    %cst_16 = arith.constant dense<0.000000e+00> : vector<2x8x8xf32>
    %58 = tpu.matmul %55, %49, %cst_16 {dimension_numbers = #tpu.dot_dimension_numbers<[2], [1], [1], [2], [0, 0, 0, 1, 1, 2], [0], [0]>} : vector<2x8x8xf32>, vector<2x8x8xf32>, vector<2x8x8xf32> -> vector<2x8x8xf32>
    "tpu.trace_stop"() : () -> ()
    %59 = tpu.reciprocal %57 : vector<2x8x1xf32> -> vector<2x8x1xf32>
    %60 = vector.broadcast %59 : vector<2x8x1xf32> to vector<2x8x8xf32>
    %61 = arith.mulf %58, %60 : vector<2x8x8xf32>
    %62 = vector.shape_cast %61 : vector<2x8x8xf32> to vector<16x8xf32>
    %63 = vector.extract_strided_slice %5 {offsets = [0, 24], sizes = [16, 8], strides = [1, 1]} : vector<16x96xf32> to vector<16x8xf32>
    %64 = vector.shape_cast %63 : vector<16x8xf32> to vector<2x8x8xf32>
    %65 = vector.extract_strided_slice %5 {offsets = [0, 56], sizes = [16, 8], strides = [1, 1]} : vector<16x96xf32> to vector<16x8xf32>
    %66 = vector.shape_cast %65 : vector<16x8xf32> to vector<2x8x8xf32>
    %67 = vector.extract_strided_slice %5 {offsets = [0, 88], sizes = [16, 8], strides = [1, 1]} : vector<16x96xf32> to vector<16x8xf32>
    %68 = vector.shape_cast %67 : vector<16x8xf32> to vector<2x8x8xf32>
    "tpu.trace_start"() <{level = 10 : i32, message = "tqe,tke->tqk"}> : () -> ()
    %cst_17 = arith.constant dense<0.000000e+00> : vector<2x8x8xf32>
    %69 = tpu.matmul %64, %66, %cst_17 {dimension_numbers = #tpu.dot_dimension_numbers<[2], [2], [1], [1], [0, 0, 0, 1, 1, 1], [0], [0]>} : vector<2x8x8xf32>, vector<2x8x8xf32>, vector<2x8x8xf32> -> vector<2x8x8xf32>
    "tpu.trace_stop"() : () -> ()
    %cst_18 = arith.constant dense<0xFF800000> : vector<2x8xf32>
    %70 = vector.multi_reduction <maximumf>, %69, %cst_18 [2] : vector<2x8x8xf32> to vector<2x8xf32>
    %71 = vector.shape_cast %70 : vector<2x8xf32> to vector<2x8x1xf32>
    %72 = vector.broadcast %71 : vector<2x8x1xf32> to vector<2x8x8xf32>
    %73 = arith.subf %69, %72 : vector<2x8x8xf32>
    %74 = math.exp %73 : vector<2x8x8xf32>
    %cst_19 = arith.constant dense<0.000000e+00> : vector<2x8xf32>
    %75 = vector.multi_reduction <add>, %74, %cst_19 [2] : vector<2x8x8xf32> to vector<2x8xf32>
    %76 = vector.shape_cast %75 : vector<2x8xf32> to vector<2x8x1xf32>
    "tpu.trace_start"() <{level = 10 : i32, message = "tqk,tke->tqe"}> : () -> ()
    %cst_20 = arith.constant dense<0.000000e+00> : vector<2x8x8xf32>
    %77 = tpu.matmul %74, %68, %cst_20 {dimension_numbers = #tpu.dot_dimension_numbers<[2], [1], [1], [2], [0, 0, 0, 1, 1, 2], [0], [0]>} : vector<2x8x8xf32>, vector<2x8x8xf32>, vector<2x8x8xf32> -> vector<2x8x8xf32>
    "tpu.trace_stop"() : () -> ()
    %78 = tpu.reciprocal %76 : vector<2x8x1xf32> -> vector<2x8x1xf32>
    %79 = vector.broadcast %78 : vector<2x8x1xf32> to vector<2x8x8xf32>
    %80 = arith.mulf %77, %79 : vector<2x8x8xf32>
    %81 = vector.shape_cast %80 : vector<2x8x8xf32> to vector<16x8xf32>
    %82 = tpu.concatenate %24, %43, %62, %81 in 1 : vector<16x8xf32>, vector<16x8xf32>, vector<16x8xf32>, vector<16x8xf32> -> vector<16x32xf32>
    %c0_21 = arith.constant 0 : index
    %c0_22 = arith.constant 0 : index
    %83 = vector.load %arg4[%c0_21, %c0_22] : memref<32x32xf32, #tpu.memory_space<vmem>>, vector<32x32xf32>
    %cst_23 = arith.constant dense<0.000000e+00> : vector<16x32xf32>
    %84 = tpu.matmul %82, %83, %cst_23 {dimension_numbers = #tpu.dot_dimension_numbers<[1], [0], [0], [1], [0, 0, 1, 1], [], []>} : vector<16x32xf32>, vector<32x32xf32>, vector<16x32xf32> -> vector<16x32xf32>
    %c0_24 = arith.constant 0 : index
    %c0_25 = arith.constant 0 : index
    %85 = vector.load %arg5[%c0_24, %c0_25] : memref<1x32xf32, #tpu.memory_space<vmem>>, vector<1x32xf32>
    %86 = vector.broadcast %85 : vector<1x32xf32> to vector<16x32xf32>
    %87 = arith.addf %84, %86 : vector<16x32xf32>
    %c0_26 = arith.constant 0 : index
    %c0_27 = arith.constant 0 : index
    %88 = vector.load %arg6[%c0_26, %c0_27] : memref<16x32xf32, #tpu.memory_space<vmem>>, vector<16x32xf32>
    tpu.vector_store %arg6[%c0_26, %c0_27], %87 {strides = array<i32>} : memref<16x32xf32, #tpu.memory_space<vmem>>, vector<16x32xf32>,
    return
  }
  func.func @transform_0(%arg0: i32) -> (i32, i32) {
    %c0_i32 = arith.constant 0 : i32
    %c0_i32_0 = arith.constant 0 : i32
    return %arg0, %c0_i32 : i32, i32
  }
  func.func @transform_1(%arg0: i32) -> (i32, i32) {
    %c0_i32 = arith.constant 0 : i32
    %c0_i32_0 = arith.constant 0 : i32
    %c0_i32_1 = arith.constant 0 : i32
    return %c0_i32, %c0_i32_0 : i32, i32
  }
  func.func @transform_2(%arg0: i32) -> (i32, i32) {
    %c0_i32 = arith.constant 0 : i32
    %c0_i32_0 = arith.constant 0 : i32
    %c0_i32_1 = arith.constant 0 : i32
    return %c0_i32, %c0_i32_0 : i32, i32
  }
  func.func @transform_3(%arg0: i32) -> (i32, i32) {
    %c0_i32 = arith.constant 0 : i32
    %c0_i32_0 = arith.constant 0 : i32
    %c0_i32_1 = arith.constant 0 : i32
    return %c0_i32, %c0_i32_0 : i32, i32
  }
  func.func @transform_4(%arg0: i32) -> (i32, i32) {
    %c0_i32 = arith.constant 0 : i32
    %c0_i32_0 = arith.constant 0 : i32
    %c0_i32_1 = arith.constant 0 : i32
    return %c0_i32, %c0_i32_0 : i32, i32
  }
  func.func @transform_5(%arg0: i32) -> (i32, i32) {
    %c0_i32 = arith.constant 0 : i32
    %c0_i32_0 = arith.constant 0 : i32
    return %arg0, %c0_i32 : i32, i32
  }
}

</mosaic_0001>

<bundles_post_ra>
// kernel: tpu_custom_call.1
= control target key start
LH: loop header
LB: loop body
LE: loop exit
PB: predicated region body
PF: predicated region fallthrough
CT: control target
= control target key end

     0   :  { %10 = vsyncpa [#allocation3], 0  ;;  %s2252_s0 = inlined_call_operand.hbm [shape: f32[16,32], index: 0, kind: input, shape index: {}]   ;;  %s2253_s1 = inlined_call_operand.hbm [shape: f32[32,96], index: 1, kind: input, shape index: {}]   ;;  %s2254_s2 = inlined_call_operand.vmem [shape: f32[1,96], index: 2, kind: input, shape index: {}]   ;;  %s2255_s3 = inlined_call_operand.hbm [shape: f32[32,32], index: 3, kind: input, shape index: {}]   ;;  %s2256_s4 = inlined_call_operand.vmem [shape: f32[1,32], index: 4, kind: input, shape index: {}]   ;;  %s2257_s5 = inlined_call_operand.hbm [shape: f32[16,32], index: 5, kind: output, shape index: {}]  }
   0x1   :  { %11 = vsyncpa [#allocation6], 0 }
   0x2   :  { %12 = vsyncpa [#allocation4], 0  ;;  %s1959_s18 = smov [#allocation5]   ;;  %s1960_s20 = smov [#allocation2]  }
   0x3   :  { %s30_s19 = sshll.u32 %s1959_s18, 4  ;;  %s18_s21 = sshll.u32 %s1960_s20, 4  ;;  %s31_s19 = int_to_ptr.vmem [resolvable:$true] %s30_s19  ;;  %s2010_s21 = int_to_ptr.vmem [resolvable:$true] %s18_s21 }
   0x4   :  { %s1865_s24 = scalar_lea.hbm %s2253_s1, 512 }
   0x5   :  { %p1866_p0 = scmp.ne.s32.totalorder %s2253_s1, %s1865_s24  ;;  %p1869_p1 = scmp.lt.u32.totalorder %s1865_s24, %s2253_s1 }
   0x7   :  { %p1871_p2 = pnand %p1869_p1, %p1866_p0 }
   0x9   :  { %1874 = shalt.err (!%p1871_p2)
}
   0xa   :  { %s1875_s29 = scalar_lea.vmem %s31_s19, 512  ;;  %p1880_p4 = scmp.lt.s32.totalorder %s31_s19, %s31_s19 }
   0xb   :  { %p1876_p3 = scmp.ne.s32.totalorder %s31_s19, %s1875_s29  ;;  %p1881_p5 = scmp.lt.s32.totalorder %s1875_s29, %s1875_s29 }
   0xd   :  { %p1882_p6 = por %p1881_p5, %p1880_p4 }
   0xf   :  { %p1883_p7 = pnand %p1882_p6, %p1876_p3 }
  0x11   :  { %1886 = shalt.err (!%p1883_p7)
}
  0x12   :  { %s1961_s30 = smov 128   ;;  %s1962_s6 = smov 8  }
  0x13   :  { %36 = dma.hbm_to_vmem [thread:$0]  %s2253_s1, 512, %s31_s19, [#allocation6], %s1961_s30, %s1961_s30, %s1962_s6  }
  0x14   :  { %s1887_s11 = scalar_lea.hbm %s2252_s0, 256 }
  0x15   :  { %p1888_p8 = scmp.ne.s32.totalorder %s2252_s0, %s1887_s11  ;;  %p1891_p9 = scmp.lt.u32.totalorder %s1887_s11, %s2252_s0 }
  0x17   :  { %p1893_p10 = pnand %p1891_p9, %p1888_p8 }
  0x19   :  { %1896 = shalt.err (!%p1893_p10)
}
  0x1a   :  { %s1897_s16 = scalar_lea.vmem %s2010_s21, 256  ;;  %p1902_p12 = scmp.lt.s32.totalorder %s2010_s21, %s2010_s21 }
  0x1b   :  { %p1898_p11 = scmp.ne.s32.totalorder %s2010_s21, %s1897_s16  ;;  %p1903_p13 = scmp.lt.s32.totalorder %s1897_s16, %s1897_s16 }
  0x1d   :  { %p1904_p0 = por %p1903_p13, %p1902_p12 }
  0x1f   :  { %p1905_p1 = pnand %p1904_p0, %p1898_p11 }
  0x21   :  { %1908 = shalt.err (!%p1905_p1)
}
  0x22   :  { %24 = dma.hbm_to_vmem [thread:$0]  %s2252_s0, 256, %s2010_s21, [#allocation3], %s1961_s30, %s1961_s30, %s1962_s6  }
  0x23   :  { %s1963_s18 = smov [#allocation7]   ;;  %s1909_s23 = scalar_lea.hbm %s2255_s3, 512 }
  0x24   :  { %s44_s19 = sshll.u32 %s1963_s18, 4  ;;  %p1910_p2 = scmp.ne.s32.totalorder %s2255_s3, %s1909_s23  ;;  %s45_s19 = int_to_ptr.vmem [resolvable:$true] %s44_s19 }
  0x25   :  { %p1913_p3 = scmp.lt.u32.totalorder %s1909_s23, %s2255_s3 }
  0x27   :  { %p1915_p4 = pnand %p1913_p3, %p1910_p2 }
  0x29   :  { %1918 = shalt.err (!%p1915_p4)
}
  0x2a   :  { %s1919_s28 = scalar_lea.vmem %s45_s19, 512  ;;  %p1924_p6 = scmp.lt.s32.totalorder %s45_s19, %s45_s19 }
  0x2b   :  { %p1920_p5 = scmp.ne.s32.totalorder %s45_s19, %s1919_s28  ;;  %p1925_p7 = scmp.lt.s32.totalorder %s1919_s28, %s1919_s28 }
  0x2d   :  { %p1926_p8 = por %p1925_p7, %p1924_p6 }
  0x2f   :  { %p1927_p9 = pnand %p1926_p8, %p1920_p5 }
  0x31   :  { %1930 = shalt.err (!%p1927_p9)
}
  0x32   :  { %50 = dma.hbm_to_vmem [thread:$0]  %s2255_s3, 512, %s45_s19, [#allocation6], %s1961_s30, %s1961_s30, %s1962_s6  }
  0x33   :  { %1953 = dma.done.wait [#allocation3], 256  }
  0x34   :  { %1954 = vsyncadd [#allocation3], 4294967040 }
  0x35   :  { %1955 = dma.done.wait [#allocation6], 1024  }
  0x36   :  { %1956 = vsyncadd [#allocation6], 4294966272  ;;  %vm75_vm0 = vcmask 261120   ;;  %v64_v0 = vld [vmem:[#allocation5] sm:$0xff]  ;;  %v65_v1 = vld [vmem:[#allocation5 + $0x8] sm:$0xff]  ;;  %v1964_v8 = vmov 0.0  }
  0x37   :  { %v66_v2 = vld [vmem:[#allocation5 + $0x10] sm:$0xff]  ;;  %v1796_v3 = vpack.c.bf16 %v65_v1, %v64_v0  ;;  %v67_v4 = vld [vmem:[#allocation5 + $0x18] sm:$0xff]  ;;  %1705 = vmatprep.subr.mxu1 %v1964_v8  ;;  %vm1965_vm1 = vmmov 0   ;;  %s1966_s7 = smov 96   ;;  %s1967_s8 = smov 64   ;;  %vm160_vm2 = vcmask 64512  }
  0x38   :  { %v62_v5 = vld [vmem:[#allocation2] sm:$0xff]  ;;  %v1800_v6 = vpack.c.bf16 %v67_v4, %v66_v2  ;;  %v63_v7 = vld [vmem:[#allocation2 + $0x8] sm:$0xff]  ;;  %1707 = vmatprep.mubr.msk.f32.mxu1 %vm1965_vm1, %v1964_v8  ;;  %s1968_s9 = smov 88   ;;  %s1970_s10 = smov 56   ;;  %vm1505_vm3 = vcmask 195584   ;;  %vm1502_vm4 = vcmask 130048  }
  0x39   :  { %1702 = vmatprep.mubr.msk.f32.mxu0 %vm75_vm0, %v62_v5  ;;  %1797 = vmatprep.subr.bf16.mxu0 %v1796_v3  ;;  %v1620_v9 = vld [vmem:[%s2254_s2] ss:$0 sm:$0xff]  ;;  %s1969_s2 = smov 120   ;;  %s1971_s11 = smov 80  }
  0x3a   :  { %1799 = vmatpush3.bf16.msra.mxu0 %v1796_v3  ;;  %s1972_s12 = smov 112   ;;  %s1973_s13 = smov 48  }
  0x3b   :  { %1801 = vmatprep.subr.bf16.mxu0 %v1800_v6  ;;  %s1974_s14 = smov 72   ;;  %s1975_s15 = smov 104  }
  0x3c   :  { %s1976_s16 = smov 40   ;;  %s1977_s1 = smov 16  }
  0x3d   :  { %s1978_s17 = smov 24   ;;  %s1979_s20 = smov [#allocation8]  }
  0x3e   :  { %1803 = vmatpush3.bf16.msra.mxu0 %v1800_v6  ;;  %s1607_s22 = sshll.u32 %s1979_s20, 4  ;;  %s1608_s22 = int_to_ptr.vmem [resolvable:$true] %s1607_s22 }
  0x3f   :  { %1725 = vmatprep.subr.mxu0 %v1964_v8  ;;  %s1931_s23 = scalar_lea.vmem %s1608_s22, 256  ;;  %p1936_p11 = scmp.lt.s32.totalorder %s1608_s22, %s1608_s22 }
  0x40   :  { %p1932_p10 = scmp.ne.s32.totalorder %s1608_s22, %s1931_s23  ;;  %p1937_p12 = scmp.lt.s32.totalorder %s1931_s23, %s1931_s23 }
  0x41   :  { %1703 = vmatmul.mubr.msk.f32.vlgmr.msra.gmra.mrb[0].mxu0 %vm75_vm0, %v63_v7 }
  0x42   :  { %1727 = vmatprep.mubr.msk.f32.mxu0 %vm1965_vm1, %v1964_v8  ;;  %p1938_p13 = por %p1937_p12, %p1936_p11 }
  0x44   :  { %p1939_p0 = pnand %p1938_p13, %p1932_p10 }
 0x114   :  { %v1704_v10 = vpop.f32.mrb[0].mxu0 }
 0x115   :  { %v148_v11 = vpop.f32.mrb[1].mxu0  ;;  %v2076_v13 = vadd.f32 %v1704_v10, %v1620_v9 }
 0x116   :  { %v2073_v12 = vadd.f32 %v1620_v9, %v148_v11 }
 0x118   :  { %158 = vrot.lane.b32.xlu0 %v2073_v12, %s1966_s7 }
 0x11c   :  { %236 = vrot.lane.b32.xlu0 %v2076_v13, %s1966_s7 }
 0x120   :  { %330 = vrot.lane.b32.xlu0 %v2073_v12, %s1967_s8 }
 0x124   :  { %488 = vrot.lane.b32.xlu0 %v2073_v12, %s1968_s9 }
 0x128   :  { %566 = vrot.lane.b32.xlu0 %v2076_v13, %s1968_s9 }
 0x12c   :  { %486 = vrot.lane.b32.xlu0 %v2073_v12, %s1969_s2 }
 0x130   :  { %564 = vrot.lane.b32.xlu0 %v2076_v13, %s1969_s2 }
 0x134   :  { %660 = vrot.lane.b32.xlu0 %v2073_v12, %s1970_s10 }
 0x18a   :  { %v159_v14 = vpop.permute.xlu0 %158 }
 0x18b   :  { %1706 = vmatpush3.xpose.msk.msra.mxu1 %vm160_vm2, %v159_v14 }
 0x18c   :  { %1710 = vmatprep.subr.mxu1 %v1964_v8 }
 0x18e   :  { %1708 = vmatmul.mubr.msk.f32.vlgmr.msra.gmra.mrb[0].mxu1 %vm160_vm2, %v2073_v12  ;;  %v237_v15 = vpop.permute.xlu0 %236 }
 0x18f   :  { %1711 = vmatpush3.xpose.msk.msra.mxu1 %vm160_vm2, %v237_v15  ;;  %1712 = vmatprep.mubr.msk.f32.mxu1 %vm1965_vm1, %v1964_v8 }
 0x190   :  { %1715 = vmatprep.subr.mxu1 %v1964_v8 }
 0x192   :  { %1713 = vmatmul.mubr.msk.f32.vlgmr.msra.gmra.mrb[2].mxu1 %vm160_vm2, %v2076_v13  ;;  %v331_v16 = vpop.permute.xlu0 %330 }
 0x193   :  { %1716 = vmatpush3.msra.mxu1 %v331_v16  ;;  %1717 = vmatprep.mubr.msk.f32.mxu1 %vm1965_vm1, %v1964_v8 }
 0x194   :  { %1720 = vmatprep.subr.mxu1 %v1964_v8 }
 0x196   :  { %v489_v17 = vpop.permute.xlu0 %488 }
 0x197   :  { %1726 = vmatpush3.xpose.msk.msra.mxu0 %vm160_vm2, %v489_v17 }
 0x198   :  { %1735 = vmatprep.subr.mxu0 %v1964_v8 }
 0x19a   :  { %v567_v18 = vpop.permute.xlu0 %566 }
 0x19e   :  { %v487_v19 = vpop.permute.xlu0 %486 }
 0x19f   :  { %1728 = vmatmul.mubr.msk.f32.vlgmr.msra.gmra.mrb[2].mxu0 %vm160_vm2, %v487_v19 }
 0x1a0   :  { %1737 = vmatprep.mubr.msk.f32.mxu0 %vm1965_vm1, %v1964_v8 }
 0x1a2   :  { %v565_v20 = vpop.permute.xlu0 %564 }
 0x1a6   :  { %v661_v21 = vpop.permute.xlu0 %660 }
 0x1a7   :  { %1736 = vmatpush3.msra.mxu0 %v661_v21 }
 0x1a8   :  { %1745 = vmatprep.subr.mxu0 %v1964_v8 }
 0x261   :  { %v231_v22 = vpop.f32.mrb[0].mxu1 }
 0x262   :  { %v1709_v23 = vpop.f32.mrb[1].mxu1  ;;  %v312_v24 = vsel %vm160_vm2, %v231_v22, -inf }
 0x263   :  { %313 = vmax.xlane.f32.xlu1 %v312_v24 }
 0x265   :  { %v308_v25 = vpop.f32.mrb[2].mxu1 }
 0x266   :  { %v1714_v26 = vpop.f32.mrb[3].mxu1  ;;  %v315_v27 = vsel %vm160_vm2, %v308_v25, -inf }
 0x267   :  { %316 = vmax.xlane.f32.xlu1 %v315_v27 }
 0x272   :  { %v560_v28 = vpop.f32.mrb[2].mxu0 }
 0x273   :  { %v1729_v29 = vpop.f32.mrb[3].mxu0  ;;  %v642_v30 = vsel %vm160_vm2, %v560_v28, -inf }
 0x278   :  { %406 = vrot.lane.b32.xlu1 %v2076_v13, %s1967_s8 }
 0x29c   :  { %643 = vmax.xlane.f32.xlu1 %v642_v30 }
 0x2ad   :  { %736 = vrot.lane.b32.xlu1 %v2076_v13, %s1970_s10 }
 0x2b1   :  { %818 = vrot.lane.b32.xlu1 %v2073_v12, %s1971_s11 }
 0x2b5   :  { %816 = vrot.lane.b32.xlu1 %v2073_v12, %s1972_s12 }
 0x2f0   :  { %v314_v31 = vpop.xlane.xlu1 %313 }
 0x2f1   :  { %v318_v32 = vsub.f32 %v231_v22, %v314_v31 }
 0x2f3   :  { %v320_v33 = vmul.f32 1.442695, %v318_v32 }
 0x2f4   :  { %v317_v34 = vpop.xlane.xlu1 %316 }
 0x2f5   :  { %1833 = vpow2.f32 %v320_v33  ;;  %v319_v35 = vsub.f32 %v308_v25, %v317_v34 }
 0x2f7   :  { %v322_v36 = vmul.f32 1.442695, %v319_v35 }
 0x2f8   :  { %v407_v38 = vpop.permute.xlu1 %406 }
 0x2f9   :  { %1835 = vpow2.f32 %v322_v36 }
 0x2ff   :  { %v2117_v37 = vpop.eup %1833 }
 0x300   :  { %1718 = vmatmul.mubr.msk.f32.vlgmr.msra.gmra.mrb[4].mxu1 %vm160_vm2, %v2117_v37 }
 0x301   :  { %1721 = vmatpush3.msra.mxu1 %v407_v38  ;;  %1722 = vmatprep.mubr.msk.f32.mxu1 %vm1965_vm1, %v1964_v8 }
 0x302   :  { %1730 = vmatprep.subr.mxu1 %v1964_v8 }
 0x303   :  { %v2124_v39 = vpop.eup %1835 }
 0x304   :  { %1723 = vmatmul.mubr.msk.f32.vlgmr.msra.gmra.mrb[6].mxu1 %vm160_vm2, %v2124_v39 }
 0x305   :  { %1732 = vmatprep.mubr.msk.f32.mxu1 %vm1965_vm1, %v1964_v8 }
 0x308   :  { %1731 = vmatpush3.xpose.msk.msra.mxu1 %vm160_vm2, %v567_v18 }
 0x309   :  { %1740 = vmatprep.subr.mxu1 %v1964_v8 }
 0x30b   :  { %1733 = vmatmul.mubr.msk.f32.vlgmr.msra.gmra.mrb[8].mxu1 %vm160_vm2, %v565_v20 }
 0x30c   :  { %1742 = vmatprep.mubr.msk.f32.mxu1 %vm1965_vm1, %v1964_v8 }
 0x329   :  { %v644_v40 = vpop.xlane.xlu1 %643 }
 0x32a   :  { %v648_v41 = vsub.f32 %v560_v28, %v644_v40 }
 0x32c   :  { %v650_v42 = vmul.f32 1.442695, %v648_v41 }
 0x32d   :  { %v737_v43 = vpop.permute.xlu1 %736 }
 0x32e   :  { %1837 = vpow2.f32 %v650_v42  ;;  %1741 = vmatpush3.msra.mxu1 %v737_v43  ;;  %v324_v43 = vsel %vm160_vm2, %v2117_v37, 0.0 }
 0x32f   :  { %1750 = vmatprep.subr.mxu1 %v1964_v8 }
 0x331   :  { %v819_v44 = vpop.permute.xlu1 %818 }
 0x335   :  { %v817_v46 = vpop.permute.xlu1 %816 }
 0x338   :  { %v2136_v45 = vpop.eup %1837 }
 0x339   :  { %1738 = vmatmul.mubr.msk.f32.vlgmr.msra.gmra.mrb[4].mxu0 %vm160_vm2, %v2136_v45  ;;  %v654_v22 = vsel %vm160_vm2, %v2136_v45, 0.0 }
 0x33a   :  { %1746 = vmatpush3.xpose.msk.msra.mxu0 %vm160_vm2, %v819_v44  ;;  %1747 = vmatprep.mubr.msk.f32.mxu0 %vm1965_vm1, %v1964_v8 }
 0x33b   :  { %1755 = vmatprep.subr.mxu0 %v1964_v8 }
 0x33d   :  { %1748 = vmatmul.mubr.msk.f32.vlgmr.msra.gmra.mrb[6].mxu0 %vm160_vm2, %v817_v46 }
 0x33e   :  { %1757 = vmatprep.mubr.msk.f32.mxu0 %vm1965_vm1, %v1964_v8 }
 0x3d3   :  { %v2147_v47 = vpop.f32.mrb[4].mxu1 }
 0x3d4   :  { %v1719_v48 = vpop.f32.mrb[5].mxu1 }
 0x3d7   :  { %v2149_v49 = vpop.f32.mrb[6].mxu1 }
 0x3d8   :  { %v1724_v50 = vpop.f32.mrb[7].mxu1 }
 0x3de   :  { %v638_v51 = vpop.f32.mrb[8].mxu1 }
 0x3df   :  { %v1734_v52 = vpop.f32.mrb[9].mxu1  ;;  %v645_v53 = vsel %vm160_vm2, %v638_v51, -inf }
 0x3e0   :  { %646 = vmax.xlane.f32.xlu0 %v645_v53 }
 0x3f6   :  { %896 = vrot.lane.b32.xlu0 %v2076_v13, %s1971_s11 }
 0x3fa   :  { %894 = vrot.lane.b32.xlu0 %v2076_v13, %s1972_s12 }
 0x3fe   :  { %990 = vrot.lane.b32.xlu0 %v2073_v12, %s1973_s13 }
 0x40c   :  { %v2157_v54 = vpop.f32.mrb[4].mxu0 }
 0x40d   :  { %v1739_v55 = vpop.f32.mrb[5].mxu0 }
 0x410   :  { %v890_v56 = vpop.f32.mrb[6].mxu0 }
 0x411   :  { %v1749_v57 = vpop.f32.mrb[7].mxu0  ;;  %v972_v58 = vsel %vm160_vm2, %v890_v56, -inf }
 0x412   :  { %973 = vmax.xlane.f32.xlu1 %v972_v58 }
 0x423   :  { %1066 = vrot.lane.b32.xlu1 %v2076_v13, %s1973_s13 }
 0x427   :  { %1148 = vrot.lane.b32.xlu1 %v2073_v12, %s1974_s14 }
 0x42b   :  { %1146 = vrot.lane.b32.xlu1 %v2073_v12, %s1975_s15 }
 0x46d   :  { %v647_v59 = vpop.xlane.xlu0 %646 }
 0x46e   :  { %v649_v60 = vsub.f32 %v638_v51, %v647_v59 }
 0x470   :  { %v652_v61 = vmul.f32 1.442695, %v649_v60 }
 0x471   :  { %v897_v62 = vpop.permute.xlu0 %896 }
 0x472   :  { %1839 = vpow2.f32 %v652_v61 }
 0x475   :  { %v895_v63 = vpop.permute.xlu0 %894 }
 0x479   :  { %v991_v0 = vpop.permute.xlu0 %990 }
 0x47a   :  { %1756 = vmatpush3.msra.mxu0 %v991_v0  ;;  %v1508_v0 = vld [vmem:[#allocation7] sm:$0xff] }
 0x47b   :  { %1765 = vmatprep.subr.mxu0 %v1964_v8 }
 0x47c   :  { %v2166_v1 = vpop.eup %1839 }
 0x47d   :  { %1743 = vmatmul.mubr.msk.f32.vlgmr.msra.gmra.mrb[10].mxu1 %vm160_vm2, %v2166_v1  ;;  %v657_v40 = vsel %vm160_vm2, %v2166_v1, 0.0  ;;  %v1509_v1 = vld [vmem:[#allocation7 + $0x8] sm:$0xff] }
 0x47e   :  { %1751 = vmatpush3.xpose.msk.msra.mxu1 %vm160_vm2, %v897_v62  ;;  %1752 = vmatprep.mubr.msk.f32.mxu1 %vm1965_vm1, %v1964_v8 }
 0x47f   :  { %1760 = vmatprep.subr.mxu1 %v1964_v8 }
 0x481   :  { %1753 = vmatmul.mubr.msk.f32.vlgmr.msra.gmra.mrb[12].mxu1 %vm160_vm2, %v895_v63 }
 0x482   :  { %1762 = vmatprep.mubr.msk.f32.mxu1 %vm1965_vm1, %v1964_v8 }
 0x49f   :  { %v974_v2 = vpop.xlane.xlu1 %973 }
 0x4a0   :  { %v978_v3 = vsub.f32 %v890_v56, %v974_v2  ;;  %v1510_v2 = vld [vmem:[#allocation7 + $0x10] sm:$0xff] }
 0x4a2   :  { %v980_v4 = vmul.f32 1.442695, %v978_v3  ;;  %v1511_v3 = vld [vmem:[#allocation7 + $0x18] sm:$0xff] }
 0x4a3   :  { %v1067_v5 = vpop.permute.xlu1 %1066 }
 0x4a4   :  { %1841 = vpow2.f32 %v980_v4  ;;  %1761 = vmatpush3.msra.mxu1 %v1067_v5  ;;  %v1808_v4 = vpack.c.bf16 %v1511_v3, %v1510_v2 }
 0x4a5   :  { %1770 = vmatprep.subr.mxu1 %v1964_v8 }
 0x4a7   :  { %v1149_v6 = vpop.permute.xlu1 %1148 }
 0x4ab   :  { %v1147_v9 = vpop.permute.xlu1 %1146 }
 0x4ae   :  { %v1842_v7 = vpop.eup %1841 }
 0x4af   :  { %1758 = vmatmul.mubr.msk.f32.vlgmr.msra.gmra.mrb[8].mxu0 %vm160_vm2, %v1842_v7 }
 0x4b0   :  { %1766 = vmatpush3.xpose.msk.msra.mxu0 %vm160_vm2, %v1149_v6  ;;  %1767 = vmatprep.mubr.msk.f32.mxu0 %vm1965_vm1, %v1964_v8 }
 0x4b1   :  { %1775 = vmatprep.subr.mxu0 %v1964_v8 }
 0x4b3   :  { %1768 = vmatmul.mubr.msk.f32.vlgmr.msra.gmra.mrb[10].mxu0 %vm160_vm2, %v1147_v9 }
 0x4b4   :  { %1777 = vmatprep.mubr.msk.f32.mxu0 %vm1965_vm1, %v1964_v8 }
 0x550   :  { %v2186_v10 = vpop.f32.mrb[10].mxu1 }
 0x551   :  { %v1744_v11 = vpop.f32.mrb[11].mxu1 }
 0x554   :  { %v968_v14 = vpop.f32.mrb[12].mxu1 }
 0x555   :  { %v1754_v15 = vpop.f32.mrb[13].mxu1  ;;  %v975_v16 = vsel %vm160_vm2, %v968_v14, -inf }
 0x556   :  { %976 = vmax.xlane.f32.xlu0 %v975_v16 }
 0x56c   :  { %1226 = vrot.lane.b32.xlu0 %v2076_v13, %s1974_s14 }
 0x570   :  { %1224 = vrot.lane.b32.xlu0 %v2076_v13, %s1975_s15 }
 0x582   :  { %v2193_v17 = vpop.f32.mrb[8].mxu0 }
 0x583   :  { %v1759_v18 = vpop.f32.mrb[9].mxu0 }
 0x586   :  { %v1220_v19 = vpop.f32.mrb[10].mxu0 }
 0x587   :  { %v1769_v20 = vpop.f32.mrb[11].mxu0  ;;  %v1302_v21 = vsel %vm160_vm2, %v1220_v19, -inf }
 0x588   :  { %1303 = vmax.xlane.f32.xlu1 %v1302_v21 }
 0x599   :  { %1396 = vrot.lane.b32.xlu1 %v2076_v13, %s1976_s16 }
 0x5bd   :  { %655 = vadd.xlane.f32.xlu1 %v654_v22 }
 0x5e3   :  { %v977_v23 = vpop.xlane.xlu0 %976 }
 0x5e4   :  { %v979_v24 = vsub.f32 %v968_v14, %v977_v23 }
 0x5e6   :  { %v982_v25 = vmul.f32 1.442695, %v979_v24 }
 0x5e7   :  { %v1227_v26 = vpop.permute.xlu0 %1226 }
 0x5e8   :  { %1843 = vpow2.f32 %v982_v25 }
 0x5eb   :  { %v1225_v13 = vpop.permute.xlu0 %1224 }
 0x5f2   :  { %v1844_v27 = vpop.eup %1843 }
 0x5f3   :  { %1763 = vmatmul.mubr.msk.f32.vlgmr.msra.gmra.mrb[14].mxu1 %vm160_vm2, %v1844_v27  ;;  %v987_v28 = vsel %vm160_vm2, %v1844_v27, 0.0 }
 0x5f4   :  { %1771 = vmatpush3.xpose.msk.msra.mxu1 %vm160_vm2, %v1227_v26  ;;  %988 = vadd.xlane.f32.xlu1 %v987_v28 }
 0x5f5   :  { %1772 = vmatprep.mubr.msk.f32.mxu1 %vm1965_vm1, %v1964_v8  ;;  %1780 = vmatprep.subr.mxu1 %v1964_v8 }
 0x5f7   :  { %1773 = vmatmul.mubr.msk.f32.vlgmr.msra.gmra.mrb[16].mxu1 %vm160_vm2, %v1225_v13 }
 0x5f8   :  { %1782 = vmatprep.mubr.msk.f32.mxu1 %vm1965_vm1, %v1964_v8  ;;  %v984_v8 = vsel %vm160_vm2, %v1842_v7, 0.0 }
 0x615   :  { %v1304_v29 = vpop.xlane.xlu1 %1303 }
 0x616   :  { %v1308_v30 = vsub.f32 %v1220_v19, %v1304_v29 }
 0x618   :  { %v1310_v38 = vmul.f32 1.442695, %v1308_v30 }
 0x619   :  { %v1397_v31 = vpop.permute.xlu1 %1396 }
 0x61a   :  { %1781 = vmatpush3.msra.mxu1 %v1397_v31  ;;  %1845 = vpow2.f32 %v1310_v38 }
 0x624   :  { %v1846_v41 = vpop.eup %1845 }
 0x625   :  { %v1314_v42 = vsel %vm160_vm2, %v1846_v41, 0.0 }
 0x64a   :  { %v656_v44 = vpop.xlane.xlu1 %655 }
 0x64b   :  { %1847 = vrcp.f32 %v656_v44 }
 0x655   :  { %v1848_v45 = vpop.eup %1847 }
 0x656   :  { %v814_v46 = vmul.f32 %v1848_v45, %v2157_v54  ;;  %v327_v54 = vsel %vm160_vm2, %v2124_v39, 0.0  ;;  %v1804_v39 = vpack.c.bf16 %v1509_v1, %v1508_v0 }
 0x6c6   :  { %v1138_v32 = vpop.f32.mrb[14].mxu1 }
 0x6c7   :  { %v1764_v33 = vpop.f32.mrb[15].mxu1 }
 0x6c8   :  { %v1647_v33 = vld [vmem:[%s2256_s4] ss:$0 sm:$0xff] }
 0x6ca   :  { %v1298_v34 = vpop.f32.mrb[16].mxu1 }
 0x6cb   :  { %v1774_v35 = vpop.f32.mrb[17].mxu1  ;;  %v1305_v36 = vsel %vm160_vm2, %v1298_v34, -inf }
 0x6cc   :  { %1306 = vmax.xlane.f32.xlu0 %v1305_v36 }
 0x6e2   :  { %1320 = vrot.lane.b32.xlu0 %v2073_v12, %s1976_s16  ;;  %v989_v12 = vpop.xlane.xlu1 %988 }
 0x6e3   :  { %1849 = vrcp.f32 %v989_v12 }
 0x6ed   :  { %v1850_v48 = vpop.eup %1849 }
 0x6ee   :  { %v1145_v50 = vmul.f32 %v1850_v48, %v1138_v32 }
 0x701   :  { %658 = vadd.xlane.f32.xlu0 %v657_v40 }
 0x705   :  { %985 = vadd.xlane.f32.xlu0 %v984_v8 }
 0x709   :  { %1315 = vadd.xlane.f32.xlu0 %v1314_v42 }
 0x70d   :  { %325 = vadd.xlane.f32.xlu0 %v324_v43 }
 0x723   :  { %1478 = vrot.lane.b32.xlu0 %v814_v46, %s1962_s6 }
 0x727   :  { %1488 = vrot.lane.b32.xlu0 %v1145_v50, %s1977_s1 }
 0x759   :  { %v1307_v51 = vpop.xlane.xlu0 %1306 }
 0x75a   :  { %v1309_v52 = vsub.f32 %v1298_v34, %v1307_v51 }
 0x75c   :  { %v1312_v53 = vmul.f32 1.442695, %v1309_v52 }
 0x75d   :  { %v1321_v55 = vpop.permute.xlu0 %1320 }
 0x75e   :  { %1851 = vpow2.f32 %v1312_v53  ;;  %1776 = vmatpush3.msra.mxu0 %v1321_v55 }
 0x75f   :  { %1778 = vmatmul.mubr.msk.f32.vlgmr.msra.gmra.mrb[12].mxu0 %vm160_vm2, %v1846_v41  ;;  %1805 = vmatprep.subr.bf16.mxu0 %v1804_v39 }
 0x760   :  { %1807 = vmatpush3.bf16.msra.mxu0 %v1804_v39 }
 0x761   :  { %1809 = vmatprep.subr.bf16.mxu0 %v1808_v4 }
 0x764   :  { %1811 = vmatpush3.bf16.msra.mxu0 %v1808_v4 }
 0x768   :  { %v1852_v37 = vpop.eup %1851 }
 0x769   :  { %1783 = vmatmul.mubr.msk.f32.vlgmr.msra.gmra.mrb[18].mxu1 %vm160_vm2, %v1852_v37  ;;  %v1317_v56 = vsel %vm160_vm2, %v1852_v37, 0.0 }
 0x76a   :  { %1318 = vadd.xlane.f32.xlu1 %v1317_v56 }
 0x76e   :  { %328 = vadd.xlane.f32.xlu1 %v327_v54 }
 0x78e   :  { %v659_v57 = vpop.xlane.xlu0 %658 }
 0x78f   :  { %1853 = vrcp.f32 %v659_v57 }
 0x792   :  { %v986_v58 = vpop.xlane.xlu0 %985 }
 0x793   :  { %1855 = vrcp.f32 %v986_v58 }
 0x796   :  { %v1316_v63 = vpop.xlane.xlu0 %1315 }
 0x797   :  { %1857 = vrcp.f32 %v1316_v63 }
 0x799   :  { %v1854_v59 = vpop.eup %1853 }
 0x79a   :  { %v815_v60 = vmul.f32 %v1854_v59, %v2186_v10 }
 0x79c   :  { %1480 = vrot.lane.b32.xlu1 %v815_v60, %s1962_s6 }
 0x79d   :  { %v1856_v61 = vpop.eup %1855 }
 0x79e   :  { %v1144_v62 = vmul.f32 %v1856_v61, %v2193_v17  ;;  %v326_v17 = vpop.xlane.xlu0 %325 }
 0x7a0   :  { %1486 = vrot.lane.b32.xlu1 %v1144_v62, %s1977_s1 }
 0x7a1   :  { %v1858_v6 = vpop.eup %1857 }
 0x7a2   :  { %v1479_v23 = vpop.permute.xlu0 %1478 }
 0x7a6   :  { %v1489_v29 = vpop.permute.xlu0 %1488 }
 0x7f7   :  { %v1319_v5 = vpop.xlane.xlu1 %1318 }
 0x7f8   :  { %1859 = vrcp.f32 %v1319_v5 }
 0x7f9   :  { %1861 = vrcp.f32 %v326_v17 }
 0x7fb   :  { %v329_v18 = vpop.xlane.xlu1 %328 }
 0x7fc   :  { %1863 = vrcp.f32 %v329_v18 }
 0x802   :  { %v1860_v11 = vpop.eup %1859 }
 0x803   :  { %v1862_v20 = vpop.eup %1861 }
 0x804   :  { %v484_v21 = vmul.f32 %v1862_v20, %v2147_v47 }
 0x806   :  { %v1500_v24 = vsel %vm160_vm2, %v484_v21, %v1479_v23  ;;  %v1864_v28 = vpop.eup %1863 }
 0x807   :  { %v485_v13 = vmul.f32 %v1864_v28, %v2149_v49 }
 0x80e   :  { %v1481_v19 = vpop.permute.xlu1 %1480 }
 0x80f   :  { %v1501_v30 = vsel %vm160_vm2, %v485_v13, %v1481_v19 }
 0x810   :  { %v1504_v31 = vsel %vm1502_vm4, %v1501_v30, %v1489_v29 }
 0x812   :  { %v1487_v22 = vpop.permute.xlu1 %1486 }
 0x813   :  { %v1503_v25 = vsel %vm1502_vm4, %v1500_v24, %v1487_v22 }
 0x832   :  { %v1392_v7 = vpop.f32.mrb[12].mxu0 }
 0x833   :  { %v1474_v9 = vmul.f32 %v1858_v6, %v1392_v7  ;;  %v1779_v10 = vpop.f32.mrb[13].mxu0 }
 0x835   :  { %1494 = vrot.lane.b32.xlu1 %v1474_v9, %s1978_s17 }
 0x83c   :  { %v1468_v14 = vpop.f32.mrb[18].mxu1 }
 0x83d   :  { %v1475_v15 = vmul.f32 %v1860_v11, %v1468_v14  ;;  %v1784_v16 = vpop.f32.mrb[19].mxu1 }
 0x83f   :  { %1496 = vrot.lane.b32.xlu0 %v1475_v15, %s1978_s17 }
 0x8a7   :  { %v1495_v26 = vpop.permute.xlu1 %1494 }
 0x8a8   :  { %v1506_v27 = vsel %vm1505_vm3, %v1503_v25, %v1495_v26 }
 0x8a9   :  { %1793 = vmatprep.mubr.msk.f32.mxu0 %vm75_vm0, %v1506_v27 }
 0x8b1   :  { %v1497_v32 = vpop.permute.xlu0 %1496 }
 0x8b2   :  { %v1507_v47 = vsel %vm1505_vm3, %v1504_v31, %v1497_v32 }
 0x8b3   :  { %1794 = vmatmul.mubr.msk.f32.vlgmr.msra.gmra.mrb[14].mxu0 %vm75_vm0, %v1507_v47 }
 0x986   :  { %v1795_v34 = vpop.f32.mrb[14].mxu0 }
 0x987   :  { %v1597_v35 = vadd.f32 %v1795_v34, %v1647_v33  ;;  %v1591_v36 = vpop.f32.mrb[15].mxu0 }
 0x988   :  { %v1592_v38 = vadd.f32 %v1647_v33, %v1591_v36 }
 0x989   :  { %1601 = vst.msk [vmem:[#allocation8 + $0x8] sm:$0xff] %vm75_vm0, %v1597_v35 }
 0x98a   :  { %1600 = vst.msk [vmem:[#allocation8] sm:$0xff] %vm75_vm0, %v1592_v38 }
 0x98b   :  { %1942 = shalt.err (!%p1939_p0)
}
 0x98c   :  { %s1943_s25 = scalar_lea.hbm %s2257_s5, 256 }
 0x98d   :  { %p1944_p1 = scmp.ne.s32.totalorder %s2257_s5, %s1943_s25  ;;  %p1947_p2 = scmp.lt.u32.totalorder %s1943_s25, %s2257_s5 }
 0x98f   :  { %p1949_p3 = pnand %p1947_p2, %p1944_p1 }
 0x991   :  { %1952 = shalt.err (!%p1949_p3)
}
 0x992   :  { %1613 = dma.vmem_to_hbm [thread:$0]  %s1608_s22, 256, %s2257_s5, [#allocation4], %s1961_s30, %s1961_s30, %s1962_s6  }
 0x993   :  { %1957 = dma.done.wait [#allocation4], 256  }
 0x994   :  { %1958 = vsyncadd [#allocation4], 4294967040 }
 0x995   :  { %1617 = vsyncpa [#allocation3], 1 }
 0x996   :  { %1618 = vsyncpa [#allocation6], 1 }
 0x997   :  { %1619 = vsyncpa [#allocation4], 1 }

// kernel: tpu_custom_call.1
= control target key start
LH: loop header
LB: loop body
LE: loop exit
PB: predicated region body
PF: predicated region fallthrough
CT: control target
= control target key end

     0   :  { %10 = vsyncpa [#allocation3], 0  ;;  %s2252_s0 = inlined_call_operand.hbm [shape: f32[16,32], index: 0, kind: input, shape index: {}]   ;;  %s2253_s1 = inlined_call_operand.hbm [shape: f32[32,96], index: 1, kind: input, shape index: {}]   ;;  %s2254_s2 = inlined_call_operand.vmem [shape: f32[1,96], index: 2, kind: input, shape index: {}]   ;;  %s2255_s3 = inlined_call_operand.hbm [shape: f32[32,32], index: 3, kind: input, shape index: {}]   ;;  %s2256_s4 = inlined_call_operand.vmem [shape: f32[1,32], index: 4, kind: input, shape index: {}]   ;;  %s2257_s5 = inlined_call_operand.hbm [shape: f32[16,32], index: 5, kind: output, shape index: {}]  }
   0x1   :  { %11 = vsyncpa [#allocation6], 0 }
   0x2   :  { %12 = vsyncpa [#allocation4], 0  ;;  %s1959_s18 = smov [#allocation5]   ;;  %s1960_s20 = smov [#allocation2]  }
   0x3   :  { %s30_s19 = sshll.u32 %s1959_s18, 4  ;;  %s18_s21 = sshll.u32 %s1960_s20, 4  ;;  %s31_s19 = int_to_ptr.vmem [resolvable:$true] %s30_s19  ;;  %s2010_s21 = int_to_ptr.vmem [resolvable:$true] %s18_s21 }
   0x4   :  { %s1865_s24 = scalar_lea.hbm %s2253_s1, 512 }
   0x5   :  { %p1866_p0 = scmp.ne.s32.totalorder %s2253_s1, %s1865_s24  ;;  %p1869_p1 = scmp.lt.u32.totalorder %s1865_s24, %s2253_s1 }
   0x7   :  { %p1871_p2 = pnand %p1869_p1, %p1866_p0 }
   0x9   :  { %1874 = shalt.err (!%p1871_p2)
}
   0xa   :  { %s1875_s29 = scalar_lea.vmem %s31_s19, 512  ;;  %p1880_p4 = scmp.lt.s32.totalorder %s31_s19, %s31_s19 }
   0xb   :  { %p1876_p3 = scmp.ne.s32.totalorder %s31_s19, %s1875_s29  ;;  %p1881_p5 = scmp.lt.s32.totalorder %s1875_s29, %s1875_s29 }
   0xd   :  { %p1882_p6 = por %p1881_p5, %p1880_p4 }
   0xf   :  { %p1883_p7 = pnand %p1882_p6, %p1876_p3 }
  0x11   :  { %1886 = shalt.err (!%p1883_p7)
}
  0x12   :  { %s1961_s30 = smov 128   ;;  %s1962_s6 = smov 8  }
  0x13   :  { %36 = dma.hbm_to_vmem [thread:$0]  %s2253_s1, 512, %s31_s19, [#allocation6], %s1961_s30, %s1961_s30, %s1962_s6  }
  0x14   :  { %s1887_s11 = scalar_lea.hbm %s2252_s0, 256 }
  0x15   :  { %p1888_p8 = scmp.ne.s32.totalorder %s2252_s0, %s1887_s11  ;;  %p1891_p9 = scmp.lt.u32.totalorder %s1887_s11, %s2252_s0 }
  0x17   :  { %p1893_p10 = pnand %p1891_p9, %p1888_p8 }
  0x19   :  { %1896 = shalt.err (!%p1893_p10)
}
  0x1a   :  { %s1897_s16 = scalar_lea.vmem %s2010_s21, 256  ;;  %p1902_p12 = scmp.lt.s32.totalorder %s2010_s21, %s2010_s21 }
  0x1b   :  { %p1898_p11 = scmp.ne.s32.totalorder %s2010_s21, %s1897_s16  ;;  %p1903_p13 = scmp.lt.s32.totalorder %s1897_s16, %s1897_s16 }
  0x1d   :  { %p1904_p0 = por %p1903_p13, %p1902_p12 }
  0x1f   :  { %p1905_p1 = pnand %p1904_p0, %p1898_p11 }
  0x21   :  { %1908 = shalt.err (!%p1905_p1)
}
  0x22   :  { %24 = dma.hbm_to_vmem [thread:$0]  %s2252_s0, 256, %s2010_s21, [#allocation3], %s1961_s30, %s1961_s30, %s1962_s6  }
  0x23   :  { %s1963_s18 = smov [#allocation7]   ;;  %s1909_s23 = scalar_lea.hbm %s2255_s3, 512 }
  0x24   :  { %s44_s19 = sshll.u32 %s1963_s18, 4  ;;  %p1910_p2 = scmp.ne.s32.totalorder %s2255_s3, %s1909_s23  ;;  %s45_s19 = int_to_ptr.vmem [resolvable:$true] %s44_s19 }
  0x25   :  { %p1913_p3 = scmp.lt.u32.totalorder %s1909_s23, %s2255_s3 }
  0x27   :  { %p1915_p4 = pnand %p1913_p3, %p1910_p2 }
  0x29   :  { %1918 = shalt.err (!%p1915_p4)
}
  0x2a   :  { %s1919_s28 = scalar_lea.vmem %s45_s19, 512  ;;  %p1924_p6 = scmp.lt.s32.totalorder %s45_s19, %s45_s19 }
  0x2b   :  { %p1920_p5 = scmp.ne.s32.totalorder %s45_s19, %s1919_s28  ;;  %p1925_p7 = scmp.lt.s32.totalorder %s1919_s28, %s1919_s28 }
  0x2d   :  { %p1926_p8 = por %p1925_p7, %p1924_p6 }
  0x2f   :  { %p1927_p9 = pnand %p1926_p8, %p1920_p5 }
  0x31   :  { %1930 = shalt.err (!%p1927_p9)
}
  0x32   :  { %50 = dma.hbm_to_vmem [thread:$0]  %s2255_s3, 512, %s45_s19, [#allocation6], %s1961_s30, %s1961_s30, %s1962_s6  }
  0x33   :  { %1953 = dma.done.wait [#allocation3], 256  }
  0x34   :  { %1954 = vsyncadd [#allocation3], 4294967040 }
  0x35   :  { %1955 = dma.done.wait [#allocation6], 1024  }
  0x36   :  { %1956 = vsyncadd [#allocation6], 4294966272  ;;  %vm75_vm0 = vcmask 261120   ;;  %v64_v0 = vld [vmem:[#allocation5] sm:$0xff]  ;;  %v65_v1 = vld [vmem:[#allocation5 + $0x8] sm:$0xff]  ;;  %v1964_v8 = vmov 0.0  }
  0x37   :  { %v66_v2 = vld [vmem:[#allocation5 + $0x10] sm:$0xff]  ;;  %v1796_v3 = vpack.c.bf16 %v65_v1, %v64_v0  ;;  %v67_v4 = vld [vmem:[#allocation5 + $0x18] sm:$0xff]  ;;  %1705 = vmatprep.subr.mxu1 %v1964_v8  ;;  %vm1965_vm1 = vmmov 0   ;;  %s1966_s7 = smov 96   ;;  %s1967_s8 = smov 64   ;;  %vm160_vm2 = vcmask 64512  }
  0x38   :  { %v62_v5 = vld [vmem:[#allocation2] sm:$0xff]  ;;  %v1800_v6 = vpack.c.bf16 %v67_v4, %v66_v2  ;;  %v63_v7 = vld [vmem:[#allocation2 + $0x8] sm:$0xff]  ;;  %1707 = vmatprep.mubr.msk.f32.mxu1 %vm1965_vm1, %v1964_v8  ;;  %s1968_s9 = smov 88   ;;  %s1970_s10 = smov 56   ;;  %vm1505_vm3 = vcmask 195584   ;;  %vm1502_vm4 = vcmask 130048  }
  0x39   :  { %1702 = vmatprep.mubr.msk.f32.mxu0 %vm75_vm0, %v62_v5  ;;  %1797 = vmatprep.subr.bf16.mxu0 %v1796_v3  ;;  %v1620_v9 = vld [vmem:[%s2254_s2] ss:$0 sm:$0xff]  ;;  %s1969_s2 = smov 120   ;;  %s1971_s11 = smov 80  }
  0x3a   :  { %1799 = vmatpush3.bf16.msra.mxu0 %v1796_v3  ;;  %s1972_s12 = smov 112   ;;  %s1973_s13 = smov 48  }
  0x3b   :  { %1801 = vmatprep.subr.bf16.mxu0 %v1800_v6  ;;  %s1974_s14 = smov 72   ;;  %s1975_s15 = smov 104  }
  0x3c   :  { %s1976_s16 = smov 40   ;;  %s1977_s1 = smov 16  }
  0x3d   :  { %s1978_s17 = smov 24   ;;  %s1979_s20 = smov [#allocation8]  }
  0x3e   :  { %1803 = vmatpush3.bf16.msra.mxu0 %v1800_v6  ;;  %s1607_s22 = sshll.u32 %s1979_s20, 4  ;;  %s1608_s22 = int_to_ptr.vmem [resolvable:$true] %s1607_s22 }
  0x3f   :  { %1725 = vmatprep.subr.mxu0 %v1964_v8  ;;  %s1931_s23 = scalar_lea.vmem %s1608_s22, 256  ;;  %p1936_p11 = scmp.lt.s32.totalorder %s1608_s22, %s1608_s22 }
  0x40   :  { %p1932_p10 = scmp.ne.s32.totalorder %s1608_s22, %s1931_s23  ;;  %p1937_p12 = scmp.lt.s32.totalorder %s1931_s23, %s1931_s23 }
  0x41   :  { %1703 = vmatmul.mubr.msk.f32.vlgmr.msra.gmra.mrb[0].mxu0 %vm75_vm0, %v63_v7 }
  0x42   :  { %1727 = vmatprep.mubr.msk.f32.mxu0 %vm1965_vm1, %v1964_v8  ;;  %p1938_p13 = por %p1937_p12, %p1936_p11 }
  0x44   :  { %p1939_p0 = pnand %p1938_p13, %p1932_p10 }
 0x114   :  { %v1704_v10 = vpop.f32.mrb[0].mxu0 }
 0x115   :  { %v148_v11 = vpop.f32.mrb[1].mxu0  ;;  %v2076_v13 = vadd.f32 %v1704_v10, %v1620_v9 }
 0x116   :  { %v2073_v12 = vadd.f32 %v1620_v9, %v148_v11 }
 0x118   :  { %158 = vrot.lane.b32.xlu0 %v2073_v12, %s1966_s7 }
 0x11c   :  { %236 = vrot.lane.b32.xlu0 %v2076_v13, %s1966_s7 }
 0x120   :  { %330 = vrot.lane.b32.xlu0 %v2073_v12, %s1967_s8 }
 0x124   :  { %488 = vrot.lane.b32.xlu0 %v2073_v12, %s1968_s9 }
 0x128   :  { %566 = vrot.lane.b32.xlu0 %v2076_v13, %s1968_s9 }
 0x12c   :  { %486 = vrot.lane.b32.xlu0 %v2073_v12, %s1969_s2 }
 0x130   :  { %564 = vrot.lane.b32.xlu0 %v2076_v13, %s1969_s2 }
 0x134   :  { %660 = vrot.lane.b32.xlu0 %v2073_v12, %s1970_s10 }
 0x18a   :  { %v159_v14 = vpop.permute.xlu0 %158 }
 0x18b   :  { %1706 = vmatpush3.xpose.msk.msra.mxu1 %vm160_vm2, %v159_v14 }
 0x18c   :  { %1710 = vmatprep.subr.mxu1 %v1964_v8 }
 0x18e   :  { %1708 = vmatmul.mubr.msk.f32.vlgmr.msra.gmra.mrb[0].mxu1 %vm160_vm2, %v2073_v12  ;;  %v237_v15 = vpop.permute.xlu0 %236 }
 0x18f   :  { %1711 = vmatpush3.xpose.msk.msra.mxu1 %vm160_vm2, %v237_v15  ;;  %1712 = vmatprep.mubr.msk.f32.mxu1 %vm1965_vm1, %v1964_v8 }
 0x190   :  { %1715 = vmatprep.subr.mxu1 %v1964_v8 }
 0x192   :  { %1713 = vmatmul.mubr.msk.f32.vlgmr.msra.gmra.mrb[2].mxu1 %vm160_vm2, %v2076_v13  ;;  %v331_v16 = vpop.permute.xlu0 %330 }
 0x193   :  { %1716 = vmatpush3.msra.mxu1 %v331_v16  ;;  %1717 = vmatprep.mubr.msk.f32.mxu1 %vm1965_vm1, %v1964_v8 }
 0x194   :  { %1720 = vmatprep.subr.mxu1 %v1964_v8 }
 0x196   :  { %v489_v17 = vpop.permute.xlu0 %488 }
 0x197   :  { %1726 = vmatpush3.xpose.msk.msra.mxu0 %vm160_vm2, %v489_v17 }
 0x198   :  { %1735 = vmatprep.subr.mxu0 %v1964_v8 }
 0x19a   :  { %v567_v18 = vpop.permute.xlu0 %566 }
 0x19e   :  { %v487_v19 = vpop.permute.xlu0 %486 }
 0x19f   :  { %1728 = vmatmul.mubr.msk.f32.vlgmr.msra.gmra.mrb[2].mxu0 %vm160_vm2, %v487_v19 }
 0x1a0   :  { %1737 = vmatprep.mubr.msk.f32.mxu0 %vm1965_vm1, %v1964_v8 }
 0x1a2   :  { %v565_v20 = vpop.permute.xlu0 %564 }
 0x1a6   :  { %v661_v21 = vpop.permute.xlu0 %660 }
 0x1a7   :  { %1736 = vmatpush3.msra.mxu0 %v661_v21 }
 0x1a8   :  { %1745 = vmatprep.subr.mxu0 %v1964_v8 }
 0x261   :  { %v231_v22 = vpop.f32.mrb[0].mxu1 }
 0x262   :  { %v1709_v23 = vpop.f32.mrb[1].mxu1  ;;  %v312_v24 = vsel %vm160_vm2, %v231_v22, -inf }
 0x263   :  { %313 = vmax.xlane.f32.xlu1 %v312_v24 }
 0x265   :  { %v308_v25 = vpop.f32.mrb[2].mxu1 }
 0x266   :  { %v1714_v26 = vpop.f32.mrb[3].mxu1  ;;  %v315_v27 = vsel %vm160_vm2, %v308_v25, -inf }
 0x267   :  { %316 = vmax.xlane.f32.xlu1 %v315_v27 }
 0x272   :  { %v560_v28 = vpop.f32.mrb[2].mxu0 }
 0x273   :  { %v1729_v29 = vpop.f32.mrb[3].mxu0  ;;  %v642_v30 = vsel %vm160_vm2, %v560_v28, -inf }
 0x278   :  { %406 = vrot.lane.b32.xlu1 %v2076_v13, %s1967_s8 }
 0x29c   :  { %643 = vmax.xlane.f32.xlu1 %v642_v30 }
 0x2ad   :  { %736 = vrot.lane.b32.xlu1 %v2076_v13, %s1970_s10 }
 0x2b1   :  { %818 = vrot.lane.b32.xlu1 %v2073_v12, %s1971_s11 }
 0x2b5   :  { %816 = vrot.lane.b32.xlu1 %v2073_v12, %s1972_s12 }
 0x2f0   :  { %v314_v31 = vpop.xlane.xlu1 %313 }
 0x2f1   :  { %v318_v32 = vsub.f32 %v231_v22, %v314_v31 }
 0x2f3   :  { %v320_v33 = vmul.f32 1.442695, %v318_v32 }
 0x2f4   :  { %v317_v34 = vpop.xlane.xlu1 %316 }
 0x2f5   :  { %1833 = vpow2.f32 %v320_v33  ;;  %v319_v35 = vsub.f32 %v308_v25, %v317_v34 }
 0x2f7   :  { %v322_v36 = vmul.f32 1.442695, %v319_v35 }
 0x2f8   :  { %v407_v38 = vpop.permute.xlu1 %406 }
 0x2f9   :  { %1835 = vpow2.f32 %v322_v36 }
 0x2ff   :  { %v2117_v37 = vpop.eup %1833 }
 0x300   :  { %1718 = vmatmul.mubr.msk.f32.vlgmr.msra.gmra.mrb[4].mxu1 %vm160_vm2, %v2117_v37 }
 0x301   :  { %1721 = vmatpush3.msra.mxu1 %v407_v38  ;;  %1722 = vmatprep.mubr.msk.f32.mxu1 %vm1965_vm1, %v1964_v8 }
 0x302   :  { %1730 = vmatprep.subr.mxu1 %v1964_v8 }
 0x303   :  { %v2124_v39 = vpop.eup %1835 }
 0x304   :  { %1723 = vmatmul.mubr.msk.f32.vlgmr.msra.gmra.mrb[6].mxu1 %vm160_vm2, %v2124_v39 }
 0x305   :  { %1732 = vmatprep.mubr.msk.f32.mxu1 %vm1965_vm1, %v1964_v8 }
 0x308   :  { %1731 = vmatpush3.xpose.msk.msra.mxu1 %vm160_vm2, %v567_v18 }
 0x309   :  { %1740 = vmatprep.subr.mxu1 %v1964_v8 }
 0x30b   :  { %1733 = vmatmul.mubr.msk.f32.vlgmr.msra.gmra.mrb[8].mxu1 %vm160_vm2, %v565_v20 }
 0x30c   :  { %1742 = vmatprep.mubr.msk.f32.mxu1 %vm1965_vm1, %v1964_v8 }
 0x329   :  { %v644_v40 = vpop.xlane.xlu1 %643 }
 0x32a   :  { %v648_v41 = vsub.f32 %v560_v28, %v644_v40 }
 0x32c   :  { %v650_v42 = vmul.f32 1.442695, %v648_v41 }
 0x32d   :  { %v737_v43 = vpop.permute.xlu1 %736 }
 0x32e   :  { %1837 = vpow2.f32 %v650_v42  ;;  %1741 = vmatpush3.msra.mxu1 %v737_v43  ;;  %v324_v43 = vsel %vm160_vm2, %v2117_v37, 0.0 }
 0x32f   :  { %1750 = vmatprep.subr.mxu1 %v1964_v8 }
 0x331   :  { %v819_v44 = vpop.permute.xlu1 %818 }
 0x335   :  { %v817_v46 = vpop.permute.xlu1 %816 }
 0x338   :  { %v2136_v45 = vpop.eup %1837 }
 0x339   :  { %1738 = vmatmul.mubr.msk.f32.vlgmr.msra.gmra.mrb[4].mxu0 %vm160_vm2, %v2136_v45  ;;  %v654_v22 = vsel %vm160_vm2, %v2136_v45, 0.0 }
 0x33a   :  { %1746 = vmatpush3.xpose.msk.msra.mxu0 %vm160_vm2, %v819_v44  ;;  %1747 = vmatprep.mubr.msk.f32.mxu0 %vm1965_vm1, %v1964_v8 }
 0x33b   :  { %1755 = vmatprep.subr.mxu0 %v1964_v8 }
 0x33d   :  { %1748 = vmatmul.mubr.msk.f32.vlgmr.msra.gmra.mrb[6].mxu0 %vm160_vm2, %v817_v46 }
 0x33e   :  { %1757 = vmatprep.mubr.msk.f32.mxu0 %vm1965_vm1, %v1964_v8 }
 0x3d3   :  { %v2147_v47 = vpop.f32.mrb[4].mxu1 }
 0x3d4   :  { %v1719_v48 = vpop.f32.mrb[5].mxu1 }
 0x3d7   :  { %v2149_v49 = vpop.f32.mrb[6].mxu1 }
 0x3d8   :  { %v1724_v50 = vpop.f32.mrb[7].mxu1 }
 0x3de   :  { %v638_v51 = vpop.f32.mrb[8].mxu1 }
 0x3df   :  { %v1734_v52 = vpop.f32.mrb[9].mxu1  ;;  %v645_v53 = vsel %vm160_vm2, %v638_v51, -inf }
 0x3e0   :  { %646 = vmax.xlane.f32.xlu0 %v645_v53 }
 0x3f6   :  { %896 = vrot.lane.b32.xlu0 %v2076_v13, %s1971_s11 }
 0x3fa   :  { %894 = vrot.lane.b32.xlu0 %v2076_v13, %s1972_s12 }
 0x3fe   :  { %990 = vrot.lane.b32.xlu0 %v2073_v12, %s1973_s13 }
 0x40c   :  { %v2157_v54 = vpop.f32.mrb[4].mxu0 }
 0x40d   :  { %v1739_v55 = vpop.f32.mrb[5].mxu0 }
 0x410   :  { %v890_v56 = vpop.f32.mrb[6].mxu0 }
 0x411   :  { %v1749_v57 = vpop.f32.mrb[7].mxu0  ;;  %v972_v58 = vsel %vm160_vm2, %v890_v56, -inf }
 0x412   :  { %973 = vmax.xlane.f32.xlu1 %v972_v58 }
 0x423   :  { %1066 = vrot.lane.b32.xlu1 %v2076_v13, %s1973_s13 }
 0x427   :  { %1148 = vrot.lane.b32.xlu1 %v2073_v12, %s1974_s14 }
 0x42b   :  { %1146 = vrot.lane.b32.xlu1 %v2073_v12, %s1975_s15 }
 0x46d   :  { %v647_v59 = vpop.xlane.xlu0 %646 }
 0x46e   :  { %v649_v60 = vsub.f32 %v638_v51, %v647_v59 }
 0x470   :  { %v652_v61 = vmul.f32 1.442695, %v649_v60 }
 0x471   :  { %v897_v62 = vpop.permute.xlu0 %896 }
 0x472   :  { %1839 = vpow2.f32 %v652_v61 }
 0x475   :  { %v895_v63 = vpop.permute.xlu0 %894 }
 0x479   :  { %v991_v0 = vpop.permute.xlu0 %990 }
 0x47a   :  { %1756 = vmatpush3.msra.mxu0 %v991_v0  ;;  %v1508_v0 = vld [vmem:[#allocation7] sm:$0xff] }
 0x47b   :  { %1765 = vmatprep.subr.mxu0 %v1964_v8 }
 0x47c   :  { %v2166_v1 = vpop.eup %1839 }
 0x47d   :  { %1743 = vmatmul.mubr.msk.f32.vlgmr.msra.gmra.mrb[10].mxu1 %vm160_vm2, %v2166_v1  ;;  %v657_v40 = vsel %vm160_vm2, %v2166_v1, 0.0  ;;  %v1509_v1 = vld [vmem:[#allocation7 + $0x8] sm:$0xff] }
 0x47e   :  { %1751 = vmatpush3.xpose.msk.msra.mxu1 %vm160_vm2, %v897_v62  ;;  %1752 = vmatprep.mubr.msk.f32.mxu1 %vm1965_vm1, %v1964_v8 }
 0x47f   :  { %1760 = vmatprep.subr.mxu1 %v1964_v8 }
 0x481   :  { %1753 = vmatmul.mubr.msk.f32.vlgmr.msra.gmra.mrb[12].mxu1 %vm160_vm2, %v895_v63 }
 0x482   :  { %1762 = vmatprep.mubr.msk.f32.mxu1 %vm1965_vm1, %v1964_v8 }
 0x49f   :  { %v974_v2 = vpop.xlane.xlu1 %973 }
 0x4a0   :  { %v978_v3 = vsub.f32 %v890_v56, %v974_v2  ;;  %v1510_v2 = vld [vmem:[#allocation7 + $0x10] sm:$0xff] }
 0x4a2   :  { %v980_v4 = vmul.f32 1.442695, %v978_v3  ;;  %v1511_v3 = vld [vmem:[#allocation7 + $0x18] sm:$0xff] }
 0x4a3   :  { %v1067_v5 = vpop.permute.xlu1 %1066 }
 0x4a4   :  { %1841 = vpow2.f32 %v980_v4  ;;  %1761 = vmatpush3.msra.mxu1 %v1067_v5  ;;  %v1808_v4 = vpack.c.bf16 %v1511_v3, %v1510_v2 }
 0x4a5   :  { %1770 = vmatprep.subr.mxu1 %v1964_v8 }
 0x4a7   :  { %v1149_v6 = vpop.permute.xlu1 %1148 }
 0x4ab   :  { %v1147_v9 = vpop.permute.xlu1 %1146 }
 0x4ae   :  { %v1842_v7 = vpop.eup %1841 }
 0x4af   :  { %1758 = vmatmul.mubr.msk.f32.vlgmr.msra.gmra.mrb[8].mxu0 %vm160_vm2, %v1842_v7 }
 0x4b0   :  { %1766 = vmatpush3.xpose.msk.msra.mxu0 %vm160_vm2, %v1149_v6  ;;  %1767 = vmatprep.mubr.msk.f32.mxu0 %vm1965_vm1, %v1964_v8 }
 0x4b1   :  { %1775 = vmatprep.subr.mxu0 %v1964_v8 }
 0x4b3   :  { %1768 = vmatmul.mubr.msk.f32.vlgmr.msra.gmra.mrb[10].mxu0 %vm160_vm2, %v1147_v9 }
 0x4b4   :  { %1777 = vmatprep.mubr.msk.f32.mxu0 %vm1965_vm1, %v1964_v8 }
 0x550   :  { %v2186_v10 = vpop.f32.mrb[10].mxu1 }
 0x551   :  { %v1744_v11 = vpop.f32.mrb[11].mxu1 }
 0x554   :  { %v968_v14 = vpop.f32.mrb[12].mxu1 }
 0x555   :  { %v1754_v15 = vpop.f32.mrb[13].mxu1  ;;  %v975_v16 = vsel %vm160_vm2, %v968_v14, -inf }
 0x556   :  { %976 = vmax.xlane.f32.xlu0 %v975_v16 }
 0x56c   :  { %1226 = vrot.lane.b32.xlu0 %v2076_v13, %s1974_s14 }
 0x570   :  { %1224 = vrot.lane.b32.xlu0 %v2076_v13, %s1975_s15 }
 0x582   :  { %v2193_v17 = vpop.f32.mrb[8].mxu0 }
 0x583   :  { %v1759_v18 = vpop.f32.mrb[9].mxu0 }
 0x586   :  { %v1220_v19 = vpop.f32.mrb[10].mxu0 }
 0x587   :  { %v1769_v20 = vpop.f32.mrb[11].mxu0  ;;  %v1302_v21 = vsel %vm160_vm2, %v1220_v19, -inf }
 0x588   :  { %1303 = vmax.xlane.f32.xlu1 %v1302_v21 }
 0x599   :  { %1396 = vrot.lane.b32.xlu1 %v2076_v13, %s1976_s16 }
 0x5bd   :  { %655 = vadd.xlane.f32.xlu1 %v654_v22 }
 0x5e3   :  { %v977_v23 = vpop.xlane.xlu0 %976 }
 0x5e4   :  { %v979_v24 = vsub.f32 %v968_v14, %v977_v23 }
 0x5e6   :  { %v982_v25 = vmul.f32 1.442695, %v979_v24 }
 0x5e7   :  { %v1227_v26 = vpop.permute.xlu0 %1226 }
 0x5e8   :  { %1843 = vpow2.f32 %v982_v25 }
 0x5eb   :  { %v1225_v13 = vpop.permute.xlu0 %1224 }
 0x5f2   :  { %v1844_v27 = vpop.eup %1843 }
 0x5f3   :  { %1763 = vmatmul.mubr.msk.f32.vlgmr.msra.gmra.mrb[14].mxu1 %vm160_vm2, %v1844_v27  ;;  %v987_v28 = vsel %vm160_vm2, %v1844_v27, 0.0 }
 0x5f4   :  { %1771 = vmatpush3.xpose.msk.msra.mxu1 %vm160_vm2, %v1227_v26  ;;  %988 = vadd.xlane.f32.xlu1 %v987_v28 }
 0x5f5   :  { %1772 = vmatprep.mubr.msk.f32.mxu1 %vm1965_vm1, %v1964_v8  ;;  %1780 = vmatprep.subr.mxu1 %v1964_v8 }
 0x5f7   :  { %1773 = vmatmul.mubr.msk.f32.vlgmr.msra.gmra.mrb[16].mxu1 %vm160_vm2, %v1225_v13 }
 0x5f8   :  { %1782 = vmatprep.mubr.msk.f32.mxu1 %vm1965_vm1, %v1964_v8  ;;  %v984_v8 = vsel %vm160_vm2, %v1842_v7, 0.0 }
 0x615   :  { %v1304_v29 = vpop.xlane.xlu1 %1303 }
 0x616   :  { %v1308_v30 = vsub.f32 %v1220_v19, %v1304_v29 }
 0x618   :  { %v1310_v38 = vmul.f32 1.442695, %v1308_v30 }
 0x619   :  { %v1397_v31 = vpop.permute.xlu1 %1396 }
 0x61a   :  { %1781 = vmatpush3.msra.mxu1 %v1397_v31  ;;  %1845 = vpow2.f32 %v1310_v38 }
 0x624   :  { %v1846_v41 = vpop.eup %1845 }
 0x625   :  { %v1314_v42 = vsel %vm160_vm2, %v1846_v41, 0.0 }
 0x64a   :  { %v656_v44 = vpop.xlane.xlu1 %655 }
 0x64b   :  { %1847 = vrcp.f32 %v656_v44 }
 0x655   :  { %v1848_v45 = vpop.eup %1847 }
 0x656   :  { %v814_v46 = vmul.f32 %v1848_v45, %v2157_v54  ;;  %v327_v54 = vsel %vm160_vm2, %v2124_v39, 0.0  ;;  %v1804_v39 = vpack.c.bf16 %v1509_v1, %v1508_v0 }
 0x6c6   :  { %v1138_v32 = vpop.f32.mrb[14].mxu1 }
 0x6c7   :  { %v1764_v33 = vpop.f32.mrb[15].mxu1 }
 0x6c8   :  { %v1647_v33 = vld [vmem:[%s2256_s4] ss:$0 sm:$0xff] }
 0x6ca   :  { %v1298_v34 = vpop.f32.mrb[16].mxu1 }
 0x6cb   :  { %v1774_v35 = vpop.f32.mrb[17].mxu1  ;;  %v1305_v36 = vsel %vm160_vm2, %v1298_v34, -inf }
 0x6cc   :  { %1306 = vmax.xlane.f32.xlu0 %v1305_v36 }
 0x6e2   :  { %1320 = vrot.lane.b32.xlu0 %v2073_v12, %s1976_s16  ;;  %v989_v12 = vpop.xlane.xlu1 %988 }
 0x6e3   :  { %1849 = vrcp.f32 %v989_v12 }
 0x6ed   :  { %v1850_v48 = vpop.eup %1849 }
 0x6ee   :  { %v1145_v50 = vmul.f32 %v1850_v48, %v1138_v32 }
 0x701   :  { %658 = vadd.xlane.f32.xlu0 %v657_v40 }
 0x705   :  { %985 = vadd.xlane.f32.xlu0 %v984_v8 }
 0x709   :  { %1315 = vadd.xlane.f32.xlu0 %v1314_v42 }
 0x70d   :  { %325 = vadd.xlane.f32.xlu0 %v324_v43 }
 0x723   :  { %1478 = vrot.lane.b32.xlu0 %v814_v46, %s1962_s6 }
 0x727   :  { %1488 = vrot.lane.b32.xlu0 %v1145_v50, %s1977_s1 }
 0x759   :  { %v1307_v51 = vpop.xlane.xlu0 %1306 }
 0x75a   :  { %v1309_v52 = vsub.f32 %v1298_v34, %v1307_v51 }
 0x75c   :  { %v1312_v53 = vmul.f32 1.442695, %v1309_v52 }
 0x75d   :  { %v1321_v55 = vpop.permute.xlu0 %1320 }
 0x75e   :  { %1851 = vpow2.f32 %v1312_v53  ;;  %1776 = vmatpush3.msra.mxu0 %v1321_v55 }
 0x75f   :  { %1778 = vmatmul.mubr.msk.f32.vlgmr.msra.gmra.mrb[12].mxu0 %vm160_vm2, %v1846_v41  ;;  %1805 = vmatprep.subr.bf16.mxu0 %v1804_v39 }
 0x760   :  { %1807 = vmatpush3.bf16.msra.mxu0 %v1804_v39 }
 0x761   :  { %1809 = vmatprep.subr.bf16.mxu0 %v1808_v4 }
 0x764   :  { %1811 = vmatpush3.bf16.msra.mxu0 %v1808_v4 }
 0x768   :  { %v1852_v37 = vpop.eup %1851 }
 0x769   :  { %1783 = vmatmul.mubr.msk.f32.vlgmr.msra.gmra.mrb[18].mxu1 %vm160_vm2, %v1852_v37  ;;  %v1317_v56 = vsel %vm160_vm2, %v1852_v37, 0.0 }
 0x76a   :  { %1318 = vadd.xlane.f32.xlu1 %v1317_v56 }
 0x76e   :  { %328 = vadd.xlane.f32.xlu1 %v327_v54 }
 0x78e   :  { %v659_v57 = vpop.xlane.xlu0 %658 }
 0x78f   :  { %1853 = vrcp.f32 %v659_v57 }
 0x792   :  { %v986_v58 = vpop.xlane.xlu0 %985 }
 0x793   :  { %1855 = vrcp.f32 %v986_v58 }
 0x796   :  { %v1316_v63 = vpop.xlane.xlu0 %1315 }
 0x797   :  { %1857 = vrcp.f32 %v1316_v63 }
 0x799   :  { %v1854_v59 = vpop.eup %1853 }
 0x79a   :  { %v815_v60 = vmul.f32 %v1854_v59, %v2186_v10 }
 0x79c   :  { %1480 = vrot.lane.b32.xlu1 %v815_v60, %s1962_s6 }
 0x79d   :  { %v1856_v61 = vpop.eup %1855 }
 0x79e   :  { %v1144_v62 = vmul.f32 %v1856_v61, %v2193_v17  ;;  %v326_v17 = vpop.xlane.xlu0 %325 }
 0x7a0   :  { %1486 = vrot.lane.b32.xlu1 %v1144_v62, %s1977_s1 }
 0x7a1   :  { %v1858_v6 = vpop.eup %1857 }
 0x7a2   :  { %v1479_v23 = vpop.permute.xlu0 %1478 }
 0x7a6   :  { %v1489_v29 = vpop.permute.xlu0 %1488 }
 0x7f7   :  { %v1319_v5 = vpop.xlane.xlu1 %1318 }
 0x7f8   :  { %1859 = vrcp.f32 %v1319_v5 }
 0x7f9   :  { %1861 = vrcp.f32 %v326_v17 }
 0x7fb   :  { %v329_v18 = vpop.xlane.xlu1 %328 }
 0x7fc   :  { %1863 = vrcp.f32 %v329_v18 }
 0x802   :  { %v1860_v11 = vpop.eup %1859 }
 0x803   :  { %v1862_v20 = vpop.eup %1861 }
 0x804   :  { %v484_v21 = vmul.f32 %v1862_v20, %v2147_v47 }
 0x806   :  { %v1500_v24 = vsel %vm160_vm2, %v484_v21, %v1479_v23  ;;  %v1864_v28 = vpop.eup %1863 }
 0x807   :  { %v485_v13 = vmul.f32 %v1864_v28, %v2149_v49 }
 0x80e   :  { %v1481_v19 = vpop.permute.xlu1 %1480 }
 0x80f   :  { %v1501_v30 = vsel %vm160_vm2, %v485_v13, %v1481_v19 }
 0x810   :  { %v1504_v31 = vsel %vm1502_vm4, %v1501_v30, %v1489_v29 }
 0x812   :  { %v1487_v22 = vpop.permute.xlu1 %1486 }
 0x813   :  { %v1503_v25 = vsel %vm1502_vm4, %v1500_v24, %v1487_v22 }
 0x832   :  { %v1392_v7 = vpop.f32.mrb[12].mxu0 }
 0x833   :  { %v1474_v9 = vmul.f32 %v1858_v6, %v1392_v7  ;;  %v1779_v10 = vpop.f32.mrb[13].mxu0 }
 0x835   :  { %1494 = vrot.lane.b32.xlu1 %v1474_v9, %s1978_s17 }
 0x83c   :  { %v1468_v14 = vpop.f32.mrb[18].mxu1 }
 0x83d   :  { %v1475_v15 = vmul.f32 %v1860_v11, %v1468_v14  ;;  %v1784_v16 = vpop.f32.mrb[19].mxu1 }
 0x83f   :  { %1496 = vrot.lane.b32.xlu0 %v1475_v15, %s1978_s17 }
 0x8a7   :  { %v1495_v26 = vpop.permute.xlu1 %1494 }
 0x8a8   :  { %v1506_v27 = vsel %vm1505_vm3, %v1503_v25, %v1495_v26 }
 0x8a9   :  { %1793 = vmatprep.mubr.msk.f32.mxu0 %vm75_vm0, %v1506_v27 }
 0x8b1   :  { %v1497_v32 = vpop.permute.xlu0 %1496 }
 0x8b2   :  { %v1507_v47 = vsel %vm1505_vm3, %v1504_v31, %v1497_v32 }
 0x8b3   :  { %1794 = vmatmul.mubr.msk.f32.vlgmr.msra.gmra.mrb[14].mxu0 %vm75_vm0, %v1507_v47 }
 0x986   :  { %v1795_v34 = vpop.f32.mrb[14].mxu0 }
 0x987   :  { %v1597_v35 = vadd.f32 %v1795_v34, %v1647_v33  ;;  %v1591_v36 = vpop.f32.mrb[15].mxu0 }
 0x988   :  { %v1592_v38 = vadd.f32 %v1647_v33, %v1591_v36 }
 0x989   :  { %1601 = vst.msk [vmem:[#allocation8 + $0x8] sm:$0xff] %vm75_vm0, %v1597_v35 }
 0x98a   :  { %1600 = vst.msk [vmem:[#allocation8] sm:$0xff] %vm75_vm0, %v1592_v38 }
 0x98b   :  { %1942 = shalt.err (!%p1939_p0)
}
 0x98c   :  { %s1943_s25 = scalar_lea.hbm %s2257_s5, 256 }
 0x98d   :  { %p1944_p1 = scmp.ne.s32.totalorder %s2257_s5, %s1943_s25  ;;  %p1947_p2 = scmp.lt.u32.totalorder %s1943_s25, %s2257_s5 }
 0x98f   :  { %p1949_p3 = pnand %p1947_p2, %p1944_p1 }
 0x991   :  { %1952 = shalt.err (!%p1949_p3)
}
 0x992   :  { %1613 = dma.vmem_to_hbm [thread:$0]  %s1608_s22, 256, %s2257_s5, [#allocation4], %s1961_s30, %s1961_s30, %s1962_s6  }
 0x993   :  { %1957 = dma.done.wait [#allocation4], 256  }
 0x994   :  { %1958 = vsyncadd [#allocation4], 4294967040 }
 0x995   :  { %1617 = vsyncpa [#allocation3], 1 }
 0x996   :  { %1618 = vsyncpa [#allocation6], 1 }
 0x997   :  { %1619 = vsyncpa [#allocation4], 1 }

</bundles_post_ra>
